<compile_context>
chip_gen: v6e
topology: v6e:2x2x1
jax: 0.10.0
libtpu: 0.0.40
codegen_flags: <defaults>
</compile_context>

<pallas_src>
import jax
import jax.numpy as jnp
from jax.experimental import pallas as pl
from jax.experimental.pallas import tpu as pltpu


HIDDEN_SIZES = [512, 256, 128, 64]
TILE_B_MAX = 512  # batch rows per grid step


def _round_up(x, m):
    return ((x + m - 1) // m) * m


def _vae_kernel(x_ref, eps_ref,
                e1w_ref, e1b_ref, e2w_ref, e2b_ref,
                mvw_ref, mvb_ref,
                d1w_ref, d1b_ref, d2w_ref, d2b_ref, d3w_ref, d3b_ref,
                out_ref, mlv_ref):
    bf16 = jnp.bfloat16
    x = x_ref[...].astype(bf16)

    # ---- encoder: Linear(512,256)+ReLU, Linear(256,128)+ReLU ----
    h = jnp.dot(x, e1w_ref[...], preferred_element_type=jnp.float32) + e1b_ref[...]
    h = jnp.maximum(h, 0.0)
    h = jnp.dot(h.astype(bf16), e2w_ref[...],
                preferred_element_type=jnp.float32) + e2b_ref[...]
    h = jnp.maximum(h, 0.0)

    # ---- fused mean|log_var head: one Linear(128,128) instead of 2x Linear(128,64) ----
    mlv = jnp.dot(h.astype(bf16), mvw_ref[...],
                  preferred_element_type=jnp.float32) + mvb_ref[...]
    half = mlv.shape[-1] // 2
    mean = mlv[:, :half]
    log_var = mlv[:, half:]

    # ---- reparameterize: z = mean + eps * exp(0.5 * log_var) (f32) ----
    z = mean + eps_ref[...] * jnp.exp(log_var * 0.5)

    # ---- decoder: Linear(64,128)+ReLU, Linear(128,256)+ReLU, Linear(256,512)+Sigmoid ----
    d = jnp.dot(z.astype(bf16), d1w_ref[...],
                preferred_element_type=jnp.float32) + d1b_ref[...]
    d = jnp.maximum(d, 0.0)
    d = jnp.dot(d.astype(bf16), d2w_ref[...],
                preferred_element_type=jnp.float32) + d2b_ref[...]
    d = jnp.maximum(d, 0.0)
    d = jnp.dot(d.astype(bf16), d3w_ref[...],
                preferred_element_type=jnp.float32) + d3b_ref[...]

    out_ref[...] = jax.nn.sigmoid(d)   # EUP path, lane-dense (tile_b, 512) store
    mlv_ref[...] = mlv                 # lane-dense (tile_b, 128) store; split in wrapper


def init_params(key, hidden_sizes=HIDDEN_SIZES):
    """Deterministic init mimicking nn.Linear's default U(-1/sqrt(in), 1/sqrt(in))."""
    params = {}

    def linear(key, fan_in, fan_out):
        kw, kb = jax.random.split(key)
        bound = 1.0 / jnp.sqrt(fan_in)
        w = jax.random.uniform(kw, (fan_in, fan_out), jnp.float32, -bound, bound)
        b = jax.random.uniform(kb, (1, fan_out), jnp.float32, -bound, bound)
        return w, b

    keys = jax.random.split(key, 7)
    params["e1w"], params["e1b"] = linear(keys[0], hidden_sizes[0], hidden_sizes[1])  # 512->256
    params["e2w"], params["e2b"] = linear(keys[1], hidden_sizes[1], hidden_sizes[2])  # 256->128
    params["mw"], params["mb"] = linear(keys[2], hidden_sizes[2], hidden_sizes[3])    # 128->64
    params["vw"], params["vb"] = linear(keys[3], hidden_sizes[2], hidden_sizes[3])    # 128->64
    params["d1w"], params["d1b"] = linear(keys[4], hidden_sizes[3], hidden_sizes[2])  # 64->128
    params["d2w"], params["d2b"] = linear(keys[5], hidden_sizes[2], hidden_sizes[1])  # 128->256
    params["d3w"], params["d3b"] = linear(keys[6], hidden_sizes[1], hidden_sizes[0])  # 256->512
    return params


def prepare_params(params):
    """One-time prep: fuse mean/log_var heads and cast weights to bf16.

    Biases stay f32 (added after f32 accumulation)."""
    bf16 = jnp.bfloat16
    mvw = jnp.concatenate([params["mw"], params["vw"]], axis=1).astype(bf16)   # (128, 128)
    mvb = jnp.concatenate([params["mb"], params["vb"]], axis=1)                # (1, 128) f32
    return (
        params["e1w"].astype(bf16), params["e1b"],
        params["e2w"].astype(bf16), params["e2b"],
        mvw, mvb,
        params["d1w"].astype(bf16), params["d1b"],
        params["d2w"].astype(bf16), params["d2b"],
        params["d3w"].astype(bf16), params["d3b"],
    )


@jax.jit
def vae_forward(x, eps, prepared):
    B = x.shape[0]
    hs = HIDDEN_SIZES
    latent = hs[-1]

    # Batch tile: up to 512 rows, multiple of 8 sublanes.
    tile_b = min(TILE_B_MAX, _round_up(B, 8))
    # Ensure >= 2 grid steps whenever the batch can be split, so both of
    # v7x's TensorCores get work (no-op cost on single-TC v5e/v6e).
    if B >= 16:
        tile_b = min(tile_b, _round_up(pl.cdiv(B, 2), 8))
    grid = (pl.cdiv(B, tile_b),)

    def batch_spec(cols):
        return pl.BlockSpec((tile_b, cols), lambda i: (i, 0))

    def resident_spec(shape):
        # Full-array block, constant index -> DMA'd once, stays in VMEM.
        return pl.BlockSpec(shape, lambda i: (0, 0))

    # Advisory cost estimate so XLA schedules neighbors around the call.
    layer_dims = [(hs[0], hs[1]), (hs[1], hs[2]), (hs[2], 2 * latent),
                  (latent, hs[2]), (hs[2], hs[1]), (hs[1], hs[0])]
    matmul_flops = 2 * B * sum(k * n for k, n in layer_dims)
    weight_bytes = sum(int(w.size) * w.dtype.itemsize for w in prepared)
    io_bytes = 4 * B * (hs[0] + latent + hs[0] + 2 * latent)
    cost = pl.CostEstimate(
        flops=matmul_flops,
        transcendentals=B * (latent + hs[0]),   # exp in reparam + sigmoid
        bytes_accessed=weight_bytes + io_bytes,
    )

    out, mlv = pl.pallas_call(
        _vae_kernel,
        out_shape=(
            jax.ShapeDtypeStruct((B, hs[0]), jnp.float32),       # decoded output
            jax.ShapeDtypeStruct((B, 2 * latent), jnp.float32),  # mean | log_var slab
        ),
        grid=grid,
        in_specs=[batch_spec(hs[0]), batch_spec(latent)]
                 + [resident_spec(w.shape) for w in prepared],
        out_specs=(batch_spec(hs[0]), batch_spec(2 * latent)),
        compiler_params=pltpu.CompilerParams(
            dimension_semantics=("parallel",),
        ),
        cost_estimate=cost,
    )(x, eps, *prepared)

    mean = mlv[:, :latent]
    log_var = mlv[:, latent:]
    return out, mean, log_var


def vae_forward_ref(x, eps, params):
    """Pure-JAX reference with the same bf16-matmul / f32-accumulate recipe."""
    bf16 = jnp.bfloat16

    def mm(a, w):
        return jnp.dot(a.astype(bf16), w.astype(bf16),
                       preferred_element_type=jnp.float32)

    h = jnp.maximum(mm(x, params["e1w"]) + params["e1b"], 0.0)
    h = jnp.maximum(mm(h, params["e2w"]) + params["e2b"], 0.0)
    mean = mm(h, params["mw"]) + params["mb"]
    log_var = mm(h, params["vw"]) + params["vb"]
    z = mean + eps * jnp.exp(0.5 * log_var)
    d = jnp.maximum(mm(z, params["d1w"]) + params["d1b"], 0.0)
    d = jnp.maximum(mm(d, params["d2w"]) + params["d2b"], 0.0)
    d = jax.nn.sigmoid(mm(d, params["d3w"]) + params["d3b"])
    return d, mean, log_var


if __name__ == "__main__":
    key = jax.random.PRNGKey(0)
    k_params, k_x, k_eps = jax.random.split(key, 3)

    B = 16
    params = init_params(k_params)
    prepared = prepare_params(params)
    x = jax.random.normal(k_x, (B, HIDDEN_SIZES[0]), jnp.float32)
    # eps corresponds to torch.randn_like(log_var); generated outside the
    # kernel so the forward is deterministic and reproducible.
    eps = jax.random.normal(k_eps, (B, HIDDEN_SIZES[-1]), jnp.float32)

    out, mean, log_var = vae_forward(x, eps, prepared)
    jax.block_until_ready((out, mean, log_var))

    out_ref, mean_ref, logvar_ref = vae_forward_ref(x, eps, params)
    assert out.shape == (B, HIDDEN_SIZES[0])
    assert mean.shape == (B, HIDDEN_SIZES[-1])
    assert log_var.shape == (B, HIDDEN_SIZES[-1])
    # bf16 matmul path on both sides; loose tolerance covers MXU vs XLA
    # accumulation-order differences.
    assert jnp.allclose(mean, mean_ref, atol=2e-2, rtol=2e-2), "mean mismatch"
    assert jnp.allclose(log_var, logvar_ref, atol=2e-2, rtol=2e-2), "log_var mismatch"
    assert jnp.allclose(out, out_ref, atol=2e-2, rtol=2e-2), "out mismatch"

    print("KERNEL_OK")
</pallas_src>

<mosaic_0001>
module attributes {stable_mosaic.version = 11 : i64} {
  func.func @_vae_kernel(%arg0: i32, %arg1: memref<8x512xf32, #tpu.memory_space<vmem>>, %arg2: memref<8x64xf32, #tpu.memory_space<vmem>>, %arg3: memref<512x256xbf16, #tpu.memory_space<vmem>>, %arg4: memref<1x256xf32, #tpu.memory_space<vmem>>, %arg5: memref<256x128xbf16, #tpu.memory_space<vmem>>, %arg6: memref<1x128xf32, #tpu.memory_space<vmem>>, %arg7: memref<128x128xbf16, #tpu.memory_space<vmem>>, %arg8: memref<1x128xf32, #tpu.memory_space<vmem>>, %arg9: memref<64x128xbf16, #tpu.memory_space<vmem>>, %arg10: memref<1x128xf32, #tpu.memory_space<vmem>>, %arg11: memref<128x256xbf16, #tpu.memory_space<vmem>>, %arg12: memref<1x256xf32, #tpu.memory_space<vmem>>, %arg13: memref<256x512xbf16, #tpu.memory_space<vmem>>, %arg14: memref<1x512xf32, #tpu.memory_space<vmem>>, %arg15: memref<8x512xf32, #tpu.memory_space<vmem>>, %arg16: memref<8x128xf32, #tpu.memory_space<vmem>>) attributes {dimension_semantics = [#tpu.dimension_semantics<parallel>], iteration_bounds = array<i64: 2>, scalar_prefetch = 0 : i64, scratch_operands = 0 : i64, tpu.core_type = #tpu.core_type<tc>, window_params = [{transform_indices = @transform_0, window_bounds = array<i64: 8, 512>}, {transform_indices = @transform_1, window_bounds = array<i64: 8, 64>}, {pipeline_mode = #tpu.pipeline_mode<synchronous>, transform_indices = @transform_2, window_bounds = array<i64: 512, 256>}, {pipeline_mode = #tpu.pipeline_mode<synchronous>, transform_indices = @transform_3, window_bounds = array<i64: 1, 256>}, {pipeline_mode = #tpu.pipeline_mode<synchronous>, transform_indices = @transform_4, window_bounds = array<i64: 256, 128>}, {pipeline_mode = #tpu.pipeline_mode<synchronous>, transform_indices = @transform_5, window_bounds = array<i64: 1, 128>}, {pipeline_mode = #tpu.pipeline_mode<synchronous>, transform_indices = @transform_6, window_bounds = array<i64: 128, 128>}, {pipeline_mode = #tpu.pipeline_mode<synchronous>, transform_indices = @transform_7, window_bounds = array<i64: 1, 128>}, {pipeline_mode = #tpu.pipeline_mode<synchronous>, transform_indices = @transform_8, window_bounds = array<i64: 64, 128>}, {pipeline_mode = #tpu.pipeline_mode<synchronous>, transform_indices = @transform_9, window_bounds = array<i64: 1, 128>}, {pipeline_mode = #tpu.pipeline_mode<synchronous>, transform_indices = @transform_10, window_bounds = array<i64: 128, 256>}, {pipeline_mode = #tpu.pipeline_mode<synchronous>, transform_indices = @transform_11, window_bounds = array<i64: 1, 256>}, {pipeline_mode = #tpu.pipeline_mode<synchronous>, transform_indices = @transform_12, window_bounds = array<i64: 256, 512>}, {pipeline_mode = #tpu.pipeline_mode<synchronous>, transform_indices = @transform_13, window_bounds = array<i64: 1, 512>}, {transform_indices = @transform_14, window_bounds = array<i64: 8, 512>}, {transform_indices = @transform_15, window_bounds = array<i64: 8, 128>}]} {
    %c0 = arith.constant 0 : index
    %c0_0 = arith.constant 0 : index
    %0 = vector.load %arg1[%c0, %c0_0] : memref<8x512xf32, #tpu.memory_space<vmem>>, vector<8x512xf32>
    %1 = arith.truncf %0 : vector<8x512xf32> to vector<8x512xbf16>
    %c0_1 = arith.constant 0 : index
    %c0_2 = arith.constant 0 : index
    %2 = vector.load %arg3[%c0_1, %c0_2] : memref<512x256xbf16, #tpu.memory_space<vmem>>, vector<512x256xbf16>
    %cst = arith.constant dense<0.000000e+00> : vector<8x256xf32>
    %3 = tpu.matmul %1, %2, %cst {dimension_numbers = #tpu.dot_dimension_numbers<[1], [0], [0], [1], [0, 0, 1, 1], [], []>} : vector<8x512xbf16>, vector<512x256xbf16>, vector<8x256xf32> -> vector<8x256xf32>
    %c0_3 = arith.constant 0 : index
    %c0_4 = arith.constant 0 : index
    %4 = vector.load %arg4[%c0_3, %c0_4] : memref<1x256xf32, #tpu.memory_space<vmem>>, vector<1x256xf32>
    %5 = vector.broadcast %4 : vector<1x256xf32> to vector<8x256xf32>
    %6 = arith.addf %3, %5 : vector<8x256xf32>
    %cst_5 = arith.constant 0.000000e+00 : f32
    %7 = vector.broadcast %cst_5 : f32 to vector<8x256xf32>
    %8 = arith.maximumf %6, %7 : vector<8x256xf32>
    %9 = arith.truncf %8 : vector<8x256xf32> to vector<8x256xbf16>
    %c0_6 = arith.constant 0 : index
    %c0_7 = arith.constant 0 : index
    %10 = vector.load %arg5[%c0_6, %c0_7] : memref<256x128xbf16, #tpu.memory_space<vmem>>, vector<256x128xbf16>
    %cst_8 = arith.constant dense<0.000000e+00> : vector<8x128xf32>
    %11 = tpu.matmul %9, %10, %cst_8 {dimension_numbers = #tpu.dot_dimension_numbers<[1], [0], [0], [1], [0, 0, 1, 1], [], []>} : vector<8x256xbf16>, vector<256x128xbf16>, vector<8x128xf32> -> vector<8x128xf32>
    %c0_9 = arith.constant 0 : index
    %c0_10 = arith.constant 0 : index
    %12 = vector.load %arg6[%c0_9, %c0_10] : memref<1x128xf32, #tpu.memory_space<vmem>>, vector<1x128xf32>
    %13 = vector.broadcast %12 : vector<1x128xf32> to vector<8x128xf32>
    %14 = arith.addf %11, %13 : vector<8x128xf32>
    %cst_11 = arith.constant 0.000000e+00 : f32
    %15 = vector.broadcast %cst_11 : f32 to vector<8x128xf32>
    %16 = arith.maximumf %14, %15 : vector<8x128xf32>
    %17 = arith.truncf %16 : vector<8x128xf32> to vector<8x128xbf16>
    %c0_12 = arith.constant 0 : index
    %c0_13 = arith.constant 0 : index
    %18 = vector.load %arg7[%c0_12, %c0_13] : memref<128x128xbf16, #tpu.memory_space<vmem>>, vector<128x128xbf16>
    %cst_14 = arith.constant dense<0.000000e+00> : vector<8x128xf32>
    %19 = tpu.matmul %17, %18, %cst_14 {dimension_numbers = #tpu.dot_dimension_numbers<[1], [0], [0], [1], [0, 0, 1, 1], [], []>} : vector<8x128xbf16>, vector<128x128xbf16>, vector<8x128xf32> -> vector<8x128xf32>
    %c0_15 = arith.constant 0 : index
    %c0_16 = arith.constant 0 : index
    %20 = vector.load %arg8[%c0_15, %c0_16] : memref<1x128xf32, #tpu.memory_space<vmem>>, vector<1x128xf32>
    %21 = vector.broadcast %20 : vector<1x128xf32> to vector<8x128xf32>
    %22 = arith.addf %19, %21 : vector<8x128xf32>
    %23 = vector.extract_strided_slice %22 {offsets = [0, 0], sizes = [8, 64], strides = [1, 1]} : vector<8x128xf32> to vector<8x64xf32>
    %24 = vector.extract_strided_slice %22 {offsets = [0, 64], sizes = [8, 64], strides = [1, 1]} : vector<8x128xf32> to vector<8x64xf32>
    %c0_17 = arith.constant 0 : index
    %c0_18 = arith.constant 0 : index
    %25 = vector.load %arg2[%c0_17, %c0_18] : memref<8x64xf32, #tpu.memory_space<vmem>>, vector<8x64xf32>
    %cst_19 = arith.constant 5.000000e-01 : f32
    %26 = vector.broadcast %cst_19 : f32 to vector<8x64xf32>
    %27 = arith.mulf %24, %26 : vector<8x64xf32>
    %28 = math.exp %27 : vector<8x64xf32>
    %29 = arith.mulf %25, %28 : vector<8x64xf32>
    %30 = arith.addf %23, %29 : vector<8x64xf32>
    %31 = arith.truncf %30 : vector<8x64xf32> to vector<8x64xbf16>
    %c0_20 = arith.constant 0 : index
    %c0_21 = arith.constant 0 : index
    %32 = vector.load %arg9[%c0_20, %c0_21] : memref<64x128xbf16, #tpu.memory_space<vmem>>, vector<64x128xbf16>
    %cst_22 = arith.constant dense<0.000000e+00> : vector<8x128xf32>
    %33 = tpu.matmul %31, %32, %cst_22 {dimension_numbers = #tpu.dot_dimension_numbers<[1], [0], [0], [1], [0, 0, 1, 1], [], []>} : vector<8x64xbf16>, vector<64x128xbf16>, vector<8x128xf32> -> vector<8x128xf32>
    %c0_23 = arith.constant 0 : index
    %c0_24 = arith.constant 0 : index
    %34 = vector.load %arg10[%c0_23, %c0_24] : memref<1x128xf32, #tpu.memory_space<vmem>>, vector<1x128xf32>
    %35 = vector.broadcast %34 : vector<1x128xf32> to vector<8x128xf32>
    %36 = arith.addf %33, %35 : vector<8x128xf32>
    %cst_25 = arith.constant 0.000000e+00 : f32
    %37 = vector.broadcast %cst_25 : f32 to vector<8x128xf32>
    %38 = arith.maximumf %36, %37 : vector<8x128xf32>
    %39 = arith.truncf %38 : vector<8x128xf32> to vector<8x128xbf16>
    %c0_26 = arith.constant 0 : index
    %c0_27 = arith.constant 0 : index
    %40 = vector.load %arg11[%c0_26, %c0_27] : memref<128x256xbf16, #tpu.memory_space<vmem>>, vector<128x256xbf16>
    %cst_28 = arith.constant dense<0.000000e+00> : vector<8x256xf32>
    %41 = tpu.matmul %39, %40, %cst_28 {dimension_numbers = #tpu.dot_dimension_numbers<[1], [0], [0], [1], [0, 0, 1, 1], [], []>} : vector<8x128xbf16>, vector<128x256xbf16>, vector<8x256xf32> -> vector<8x256xf32>
    %c0_29 = arith.constant 0 : index
    %c0_30 = arith.constant 0 : index
    %42 = vector.load %arg12[%c0_29, %c0_30] : memref<1x256xf32, #tpu.memory_space<vmem>>, vector<1x256xf32>
    %43 = vector.broadcast %42 : vector<1x256xf32> to vector<8x256xf32>
    %44 = arith.addf %41, %43 : vector<8x256xf32>
    %cst_31 = arith.constant 0.000000e+00 : f32
    %45 = vector.broadcast %cst_31 : f32 to vector<8x256xf32>
    %46 = arith.maximumf %44, %45 : vector<8x256xf32>
    %47 = arith.truncf %46 : vector<8x256xf32> to vector<8x256xbf16>
    %c0_32 = arith.constant 0 : index
    %c0_33 = arith.constant 0 : index
    %48 = vector.load %arg13[%c0_32, %c0_33] : memref<256x512xbf16, #tpu.memory_space<vmem>>, vector<256x512xbf16>
    %cst_34 = arith.constant dense<0.000000e+00> : vector<8x512xf32>
    %49 = tpu.matmul %47, %48, %cst_34 {dimension_numbers = #tpu.dot_dimension_numbers<[1], [0], [0], [1], [0, 0, 1, 1], [], []>} : vector<8x256xbf16>, vector<256x512xbf16>, vector<8x512xf32> -> vector<8x512xf32>
    %c0_35 = arith.constant 0 : index
    %c0_36 = arith.constant 0 : index
    %50 = vector.load %arg14[%c0_35, %c0_36] : memref<1x512xf32, #tpu.memory_space<vmem>>, vector<1x512xf32>
    %51 = vector.broadcast %50 : vector<1x512xf32> to vector<8x512xf32>
    %52 = arith.addf %49, %51 : vector<8x512xf32>
    %53 = arith.negf %52 : vector<8x512xf32>
    %54 = math.exp %53 : vector<8x512xf32>
    %cst_37 = arith.constant 1.000000e+00 : f32
    %55 = vector.broadcast %cst_37 : f32 to vector<8x512xf32>
    %56 = arith.addf %55, %54 : vector<8x512xf32>
    %57 = arith.divf %55, %56 : vector<8x512xf32>
    %c0_38 = arith.constant 0 : index
    %c0_39 = arith.constant 0 : index
    %58 = vector.load %arg15[%c0_38, %c0_39] : memref<8x512xf32, #tpu.memory_space<vmem>>, vector<8x512xf32>
    tpu.vector_store %arg15[%c0_38, %c0_39], %57 {strides = array<i32>} : memref<8x512xf32, #tpu.memory_space<vmem>>, vector<8x512xf32>,
    %c0_40 = arith.constant 0 : index
    %c0_41 = arith.constant 0 : index
    %59 = vector.load %arg16[%c0_40, %c0_41] : memref<8x128xf32, #tpu.memory_space<vmem>>, vector<8x128xf32>
    tpu.vector_store %arg16[%c0_40, %c0_41], %22 {strides = array<i32>} : memref<8x128xf32, #tpu.memory_space<vmem>>, vector<8x128xf32>,
    return
  }
  func.func @transform_0(%arg0: i32) -> (i32, i32) {
    %c0_i32 = arith.constant 0 : i32
    %c0_i32_0 = arith.constant 0 : i32
    return %arg0, %c0_i32 : i32, i32
  }
  func.func @transform_1(%arg0: i32) -> (i32, i32) {
    %c0_i32 = arith.constant 0 : i32
    %c0_i32_0 = arith.constant 0 : i32
    return %arg0, %c0_i32 : i32, i32
  }
  func.func @transform_2(%arg0: i32) -> (i32, i32) {
    %c0_i32 = arith.constant 0 : i32
    %c0_i32_0 = arith.constant 0 : i32
    %c0_i32_1 = arith.constant 0 : i32
    return %c0_i32, %c0_i32_0 : i32, i32
  }
  func.func @transform_3(%arg0: i32) -> (i32, i32) {
    %c0_i32 = arith.constant 0 : i32
    %c0_i32_0 = arith.constant 0 : i32
    %c0_i32_1 = arith.constant 0 : i32
    return %c0_i32, %c0_i32_0 : i32, i32
  }
  func.func @transform_4(%arg0: i32) -> (i32, i32) {
    %c0_i32 = arith.constant 0 : i32
    %c0_i32_0 = arith.constant 0 : i32
    %c0_i32_1 = arith.constant 0 : i32
    return %c0_i32, %c0_i32_0 : i32, i32
  }
  func.func @transform_5(%arg0: i32) -> (i32, i32) {
    %c0_i32 = arith.constant 0 : i32
    %c0_i32_0 = arith.constant 0 : i32
    %c0_i32_1 = arith.constant 0 : i32
    return %c0_i32, %c0_i32_0 : i32, i32
  }
  func.func @transform_6(%arg0: i32) -> (i32, i32) {
    %c0_i32 = arith.constant 0 : i32
    %c0_i32_0 = arith.constant 0 : i32
    %c0_i32_1 = arith.constant 0 : i32
    return %c0_i32, %c0_i32_0 : i32, i32
  }
  func.func @transform_7(%arg0: i32) -> (i32, i32) {
    %c0_i32 = arith.constant 0 : i32
    %c0_i32_0 = arith.constant 0 : i32
    %c0_i32_1 = arith.constant 0 : i32
    return %c0_i32, %c0_i32_0 : i32, i32
  }
  func.func @transform_8(%arg0: i32) -> (i32, i32) {
    %c0_i32 = arith.constant 0 : i32
    %c0_i32_0 = arith.constant 0 : i32
    %c0_i32_1 = arith.constant 0 : i32
    return %c0_i32, %c0_i32_0 : i32, i32
  }
  func.func @transform_9(%arg0: i32) -> (i32, i32) {
    %c0_i32 = arith.constant 0 : i32
    %c0_i32_0 = arith.constant 0 : i32
    %c0_i32_1 = arith.constant 0 : i32
    return %c0_i32, %c0_i32_0 : i32, i32
  }
  func.func @transform_10(%arg0: i32) -> (i32, i32) {
    %c0_i32 = arith.constant 0 : i32
    %c0_i32_0 = arith.constant 0 : i32
    %c0_i32_1 = arith.constant 0 : i32
    return %c0_i32, %c0_i32_0 : i32, i32
  }
  func.func @transform_11(%arg0: i32) -> (i32, i32) {
    %c0_i32 = arith.constant 0 : i32
    %c0_i32_0 = arith.constant 0 : i32
    %c0_i32_1 = arith.constant 0 : i32
    return %c0_i32, %c0_i32_0 : i32, i32
  }
  func.func @transform_12(%arg0: i32) -> (i32, i32) {
    %c0_i32 = arith.constant 0 : i32
    %c0_i32_0 = arith.constant 0 : i32
    %c0_i32_1 = arith.constant 0 : i32
    return %c0_i32, %c0_i32_0 : i32, i32
  }
  func.func @transform_13(%arg0: i32) -> (i32, i32) {
    %c0_i32 = arith.constant 0 : i32
    %c0_i32_0 = arith.constant 0 : i32
    %c0_i32_1 = arith.constant 0 : i32
    return %c0_i32, %c0_i32_0 : i32, i32
  }
  func.func @transform_14(%arg0: i32) -> (i32, i32) {
    %c0_i32 = arith.constant 0 : i32
    %c0_i32_0 = arith.constant 0 : i32
    return %arg0, %c0_i32 : i32, i32
  }
  func.func @transform_15(%arg0: i32) -> (i32, i32) {
    %c0_i32 = arith.constant 0 : i32
    %c0_i32_0 = arith.constant 0 : i32
    return %arg0, %c0_i32 : i32, i32
  }
}

</mosaic_0001>

<bundles_post_ra>
// kernel: vae_forward.1
= control target key start
LH: loop header
LB: loop body
LE: loop exit
PB: predicated region body
PF: predicated region fallthrough
CT: control target
= control target key end

     0   :  { %s3814_s0 = inlined_call_operand.hbm [shape: f32[16,512], index: 0, kind: input, shape index: {}]   ;;  %s3815_s1 = inlined_call_operand.hbm [shape: f32[16,64], index: 1, kind: input, shape index: {}]   ;;  %s3816_s2 = inlined_call_operand.hbm [shape: bf16[512,256], index: 2, kind: input, shape index: {}]   ;;  %s3817_s3 = inlined_call_operand.vmem [shape: f32[1,256], index: 3, kind: input, shape index: {}]   ;;  %s3818_s4 = inlined_call_operand.hbm [shape: bf16[256,128], index: 4, kind: input, shape index: {}]   ;;  %s3819_s5 = inlined_call_operand.vmem [shape: f32[1,128], index: 5, kind: input, shape index: {}]   ;;  %s3820_s6 = inlined_call_operand.hbm [shape: bf16[128,128], index: 6, kind: input, shape index: {}]   ;;  %s3821_s7 = inlined_call_operand.vmem [shape: f32[1,128], index: 7, kind: input, shape index: {}]   ;;  %s3822_s8 = inlined_call_operand.hbm [shape: bf16[64,128], index: 8, kind: input, shape index: {}]   ;;  %s3823_s9 = inlined_call_operand.vmem [shape: f32[1,128], index: 9, kind: input, shape index: {}]   ;;  %s3824_s10 = inlined_call_operand.hbm [shape: bf16[128,256], index: 10, kind: input, shape index: {}]   ;;  %s3825_s11 = inlined_call_operand.vmem [shape: f32[1,256], index: 11, kind: input, shape index: {}]   ;;  %s3826_s12 = inlined_call_operand.hbm [shape: bf16[256,512], index: 12, kind: input, shape index: {}]   ;;  %s3827_s13 = inlined_call_operand.vmem [shape: f32[1,512], index: 13, kind: input, shape index: {}]   ;;  %s3828_s14 = inlined_call_operand.hbm [shape: f32[16,512], index: 14, kind: output, shape index: {0}]   ;;  %s3829_s15 = inlined_call_operand.vmem [shape: f32[16,128], index: 15, kind: output, shape index: {1}]  }
   0x1   :  { %3837 = sst [smem:[#allocation25_spill]] %s3814_s0 }
   0x2   :  { %3838 = sst [smem:[#allocation26_spill]] %s3816_s2 }
   0x3   :  { %3839 = sst [smem:[#allocation27_spill]] %s3818_s4 }
   0x4   :  { %3840 = sst [smem:[#allocation28_spill]] %s3820_s6 }
   0x5   :  { %3841 = sst [smem:[#allocation29_spill]] %s3822_s8 }
   0x6   :  { %3842 = sst [smem:[#allocation30_spill]] %s3824_s10 }
   0x7   :  { %3843 = sst [smem:[#allocation31_spill]] %s3825_s11 }
   0x8   :  { %3844 = sst [smem:[#allocation32_spill]] %s3826_s12 }
   0x9   :  { %3845 = sst [smem:[#allocation33_spill]] %s3827_s13 }
   0xa   :  { %3846 = sst [smem:[#allocation34_spill]] %s3828_s14 }
   0xb   :  { %21 = vsyncpa [#allocation3], 0 }
   0xc   :  { %23 = vsyncpa [#allocation3 + $0x1], 0 }
   0xd   :  { %24 = vsyncpa [#allocation6], 0 }
   0xe   :  { %26 = vsyncpa [#allocation6 + $0x1], 0 }
   0xf   :  { %27 = vsyncpa [#allocation9], 0 }
  0x10   :  { %28 = vsyncpa [#allocation12], 0 }
  0x11   :  { %29 = vsyncpa [#allocation15], 0 }
  0x12   :  { %30 = vsyncpa [#allocation4], 0 }
  0x13   :  { %32 = vsyncpa [#allocation4 + $0x1], 0  ;;  %s3448_s18 = smov 0   ;;  %s3450_s19 = smov 0  }
  0x14   :  { %s3452_s20 = smov 0   ;;  %s3454_s21 = smov 0  }
  0x15 LB: > { %s3349_s22 = smov [#allocation7]   ;;  %s3469_s24 = sadd.s32 4294967295, %s3347_s21   ;;  %s3347_s21 = sphi %s3454_s21, %s3887_s21   ;;  %s3343_s20 = sphi %s3452_s20, %s3886_s20   ;;  %s3339_s19 = sphi %s3450_s19, %s3885_s19   ;;  %s3335_s18 = sphi %s3448_s18, %s3884_s18  }
  0x16   : > { %s411_s23 = sshll.u32 %s3349_s22, 4  ;;  %p2388_p0 = scmp.ge.s32.totalorder %s3347_s21, 1  ;;  %s412_s23 = int_to_ptr.vmem [resolvable:$true] %s411_s23 }
  0x17   : > { %p3833_p1 = scmp.eq.s32.totalorder %s3469_s24, 0  ;;  %p399_p2 = scmp.lt.s32.totalorder %s3347_s21, 3 }
  0x18   : > { %s3350_s26 = smov [#allocation8]   ;;  %s3351_s29 = smov [#allocation11]  }
  0x19   : > { %p3474_p3 = pnand %p2388_p0, %p399_p2  ;;  %s427_s27 = sshll.u32 %s3350_s26, 4  ;;  %s3487_s27 = int_to_ptr.vmem [resolvable:$true] %s427_s27 }
  0x1a   : > { %s3489_s30 = sshll.u32 %s3351_s29, 4  ;;  %s3062_s17 = scalar_lea.vmem %s412_s23, 8192  ;;  %s460_s30 = int_to_ptr.vmem [resolvable:$true] %s3489_s30 }
  0x1b   : > { %s3847_s25 = scalar_select %p3474_p3, 1, 0 }
  0x1c   : > { %p2697_p5 = pneg %p3474_p3  ;;  %p3063_p8 = scmp.ne.s32.totalorder %s412_s23, %s3062_s17 }
  0x1d   : > { %p3070_p11 = scmp.lt.s32.totalorder %s412_s23, %s412_s23  ;;  %p3071_p12 = scmp.lt.s32.totalorder %s3062_s17, %s3062_s17 }
  0x1e   : > { %p3483_p6 = pnand %p2697_p5, %p3833_p1 }
  0x1f   : > { %p3072_p13 = por %p3071_p12, %p3070_p11 }
  0x20   : > { %p3493_p7 = pneg %p3483_p6 }
  0x22   : > { %p3065_p9 = pnand %p3063_p8, %p3493_p7 }
  0x24   : > { %p3066_p10 = pneg %p3065_p9 }
  0x26   : > { %p3073_p0 = pnand %p3072_p13, %p3066_p10 }
  0x28   : > { %3076 = shalt.err (!%p3073_p0)
}
  0x29   : > { %s3831_s22 = smov 128   ;;  %s3832_s26 = smov 8  }
  0x2a   : > { %s3850_s2 = sld [smem:[#allocation26_spill]]  ;;  %s3088_s13 = scalar_lea.vmem %s3487_s27, 2048 }
  0x2b   : > { %p3089_p2 = scmp.ne.s32.totalorder %s3487_s27, %s3088_s13  ;;  %p3096_p9 = scmp.lt.s32.totalorder %s3487_s27, %s3487_s27 }
  0x2c   : > { %p3097_p10 = scmp.lt.s32.totalorder %s3088_s13, %s3088_s13 }
  0x2d   : > { %p3091_p5 = pnand %p3089_p2, %p3493_p7 }
  0x2e   : > { %p3098_p11 = por %p3097_p10, %p3096_p9 }
  0x2f   : > { %p3092_p8 = pneg %p3091_p5 }
  0x30   : > { %2700 = dma.hbm_to_vmem [thread:$0]  (!%p3483_p6), %s3850_s2, 8192, %s412_s23, [#allocation6], %s3831_s22, %s3831_s22, %s3832_s26  }
  0x31   : > { %p3099_p12 = pnand %p3098_p11, %p3092_p8 }
  0x33   : > { %3102 = shalt.err (!%p3099_p12)
}
  0x34   : > { %s3354_s17 = smov 64   ;;  %s3355_s11 = smov 4  }
  0x35   : > { %s3851_s4 = sld [smem:[#allocation27_spill]]  ;;  %s3114_s29 = scalar_lea.vmem %s460_s30, 512 }
  0x36   : > { %p3115_p13 = scmp.ne.s32.totalorder %s460_s30, %s3114_s29  ;;  %p3122_p5 = scmp.lt.s32.totalorder %s460_s30, %s460_s30 }
  0x37   : > { %p3123_p8 = scmp.lt.s32.totalorder %s3114_s29, %s3114_s29 }
  0x38   : > { %p3117_p0 = pnand %p3115_p13, %p3493_p7 }
  0x39   : > { %p3124_p9 = por %p3123_p8, %p3122_p5 }
  0x3a   : > { %p3118_p2 = pneg %p3117_p0 }
  0x3b   : > { %2703 = dma.hbm_to_vmem [thread:$0]  (!%p3483_p6), %s3851_s4, 2048, %s3487_s27, [#allocation9], %s3354_s17, %s3354_s17, %s3355_s11  }
  0x3c   : > { %p3125_p10 = pnand %p3124_p9, %p3118_p2 }
  0x3e   : > { %3128 = shalt.err (!%p3125_p10)
}
  0x3f   : > { %s3852_s8 = sld [smem:[#allocation29_spill]]  ;;  %s3356_s27 = smov [#allocation10]  }
  0x40   : > { %s443_s14 = sshll.u32 %s3356_s27, 4  ;;  %s3357_s23 = smov [#allocation13]   ;;  %s444_s14 = int_to_ptr.vmem [resolvable:$true] %s443_s14 }
  0x41   : > { %s475_s26 = sshll.u32 %s3357_s23, 4  ;;  %s3140_s2 = scalar_lea.vmem %s444_s14, 1024  ;;  %s476_s26 = int_to_ptr.vmem [resolvable:$true] %s475_s26 }
  0x42   : > { %p3141_p11 = scmp.ne.s32.totalorder %s444_s14, %s3140_s2  ;;  %p3148_p0 = scmp.lt.s32.totalorder %s444_s14, %s444_s14 }
  0x43   : > { %p3149_p2 = scmp.lt.s32.totalorder %s3140_s2, %s3140_s2 }
  0x44   : > { %p3143_p12 = pnand %p3141_p11, %p3493_p7 }
  0x45   : > { %2709 = dma.hbm_to_vmem [thread:$0]  (!%p3483_p6), %s3852_s8, 512, %s460_s30, [#allocation12], %s3354_s17, %s3354_s17, %s3355_s11  }
  0x46   : > { %p3144_p13 = pneg %p3143_p12  ;;  %p3150_p5 = por %p3149_p2, %p3148_p0 }
  0x48   : > { %p3151_p8 = pnand %p3150_p5, %p3144_p13 }
  0x4a   : > { %3154 = shalt.err (!%p3151_p8)
}
  0x4b   : > { %s3853_s6 = sld [smem:[#allocation28_spill]]  ;;  %s3166_s29 = scalar_lea.vmem %s476_s26, 2048 }
  0x4c   : > { %p3167_p9 = scmp.ne.s32.totalorder %s476_s26, %s3166_s29  ;;  %p3174_p12 = scmp.lt.s32.totalorder %s476_s26, %s476_s26 }
  0x4d   : > { %p3175_p0 = scmp.lt.s32.totalorder %s3166_s29, %s3166_s29 }
  0x4e   : > { %p3169_p10 = pnand %p3167_p9, %p3493_p7 }
  0x4f   : > { %p3176_p13 = por %p3175_p0, %p3174_p12 }
  0x50   : > { %p3170_p11 = pneg %p3169_p10 }
  0x51   : > { %2706 = dma.hbm_to_vmem [thread:$0]  (!%p3483_p6), %s3853_s6, 1024, %s444_s14, [#allocation9], %s3354_s17, %s3354_s17, %s3355_s11  }
  0x52   : > { %p3177_p2 = pnand %p3176_p13, %p3170_p11 }
  0x54   : > { %3180 = shalt.err (!%p3177_p2)
}
  0x55   : > { %s3854_s2 = smov 8   ;;  %s3855_s13 = smov 128  }
  0x56   : > { %s3856_s10 = sld [smem:[#allocation30_spill]]  ;;  %s3358_s11 = smov [#allocation14]  }
  0x57   : > { %s491_s17 = sshll.u32 %s3358_s11, 4  ;;  %s492_s17 = int_to_ptr.vmem [resolvable:$true] %s491_s17 }
  0x58   : > { %s3192_s14 = scalar_lea.vmem %s492_s17, 8192  ;;  %p3200_p10 = scmp.lt.s32.totalorder %s492_s17, %s492_s17 }
  0x59   : > { %p3193_p5 = scmp.ne.s32.totalorder %s492_s17, %s3192_s14  ;;  %p3201_p11 = scmp.lt.s32.totalorder %s3192_s14, %s3192_s14 }
  0x5b   : > { %p3195_p8 = pnand %p3193_p5, %p3493_p7  ;;  %p3202_p12 = por %p3201_p11, %p3200_p10 }
  0x5c   : > { %2712 = dma.hbm_to_vmem [thread:$0]  (!%p3483_p6), %s3856_s10, 2048, %s476_s26, [#allocation12], %s3855_s13, %s3855_s13, %s3854_s2  }
  0x5d   : > { %p3196_p9 = pneg %p3195_p8 }
  0x5f   : > { %p3203_p0 = pnand %p3202_p12, %p3196_p9 }
  0x61   : > { %3206 = shalt.err (!%p3203_p0)
}
  0x62   : > { %s3359_s30 = smov 256   ;;  %s3360_s16 = smov 16  }
  0x63   : > { %s3857_s12 = sld [smem:[#allocation32_spill]]  ;;  %s2387_s29 = sadd.s32 4294967294, %s3347_s21  }
  0x64   : > { %s3562_s2 = sadd.s32 1, %s3347_s21   ;;  %s45_s27 = sadd.s32 1, %s3343_s20 }
  0x65   : > { %s42_s13 = ssub.s32 %s3347_s21, %s3562_s2  ;;  %p52_p13 = scmp.ne.s32.totalorder %s3343_s20, %s3339_s19 }
  0x66   : > { %p43_p7 = scmp.eq.s32.totalorder %s42_s13, 0  ;;  %p53_p2 = scmp.eq.s32.totalorder %s3347_s21, 0 }
  0x67   : > { %p58_p5 = scmp.ne.s32.totalorder %s3339_s19, %s3335_s18  ;;  %p360_p9 = scmp.eq.s32.totalorder %s3469_s24, 1 }
  0x68   : > { %s3573_s23 = scalar_select %p43_p7, %s3343_s20, %s45_s27  }
  0x69   : > { %2715 = dma.hbm_to_vmem [thread:$0]  (!%p3483_p6), %s3857_s12, 8192, %s492_s17, [#allocation15], %s3359_s30, %s3359_s30, %s3360_s16  }
  0x6a   : > { %3858 = sst [smem:[#allocation24_spill]] %s3573_s23  ;;  %p3575_p8 = por %p53_p2, %p52_p13 }
  0x6b   : > { %p3581_p6 = por %p3833_p1, %p58_p5  ;;  %p366_p10 = scmp.eq.s32.totalorder %s2387_s29, 1 }
  0x6c   : > { %p2733_p11 = scmp.lt.s32.totalorder %s3347_s21, 2  ;;  %s3588_s17 = sand.u32 1, %s3343_s20  }
  0x6d   : > { %s3860_s11 = scalar_select %p3581_p6, 1, 0 }
  0x6e   : > { %p3590_p12 = por %p360_p9, %p52_p13  ;;  %p3594_p0 = por %p366_p10, %p58_p5 }
  0x6f   : > { %s2396_s16 = sshll.u32 %s3588_s17, 5  ;;  %s2597_s26 = sshll.u32 %s3347_s21, 9 }
  0x70   : > { %s3861_s14 = scalar_select %p3590_p12, 1, 0 }
  0x71   : > { %s3862_s30 = scalar_select %p3594_p0, 1, 0 }
  0x72   : > { %s3863_s0 = sld [smem:[#allocation25_spill]]  ;;  %s512_s27 = scalar_lea.vmem [#allocation2], %s2396_s16 }
  0x73   : > { %s520_s4 = sshll.u32 %s512_s27, 4  ;;  %p3609_p7 = pnand %p2733_p11, %p3575_p8  ;;  %s3605_s4 = int_to_ptr.vmem [resolvable:$true] %s520_s4 }
  0x74   : > { %s509_s12 = scalar_lea.sflag [#allocation3], %s3588_s17 }
  0x75   : > { %p3209_p2 = pneg %p3609_p7 }
  0x78   : > { %s3603_s29 = scalar_lea.hbm %s3863_s0, %s2597_s26  ;;  %s3212_s28 = scalar_lea.hbm %s3863_s0, 1024 }
  0x79   : > { %s3207_s22 = scalar_lea.hbm %s3603_s29, 512  ;;  %p3213_p8 = scmp.lt.s32.totalorder %s3603_s29, %s3863_s0 }
  0x7a   : > { %p3208_p13 = scmp.ne.s32.totalorder %s3603_s29, %s3207_s22  ;;  %p3214_p10 = scmp.lt.s32.totalorder %s3212_s28, %s3207_s22 }
  0x7c   : > { %p3210_p5 = pnand %p3209_p2, %p3208_p13  ;;  %p3215_p11 = por %p3214_p10, %p3213_p8 }
  0x7e   : > { %p3211_p9 = pneg %p3210_p5 }
  0x80   : > { %p3216_p4 = pnand %p3215_p11, %p3211_p9 }
  0x82   : > { %3219 = shalt.err (!%p3216_p4)
}
  0x83   : > { %s3220_s8 = scalar_lea.vmem %s3605_s4, 512  ;;  %s3361_s16 = smov [#allocation2]  }
  0x84   : > { %p3221_p1 = scmp.ne.s32.totalorder %s3605_s4, %s3220_s8  ;;  %s3225_s26 = sshll.u32 %s3361_s16, 4  ;;  %s3226_s26 = int_to_ptr.vmem [resolvable:$false] %s3225_s26 }
  0x85   : > { %s3227_s10 = scalar_lea.vmem %s3226_s26, 1024  ;;  %p3228_p0 = scmp.lt.s32.totalorder %s3605_s4, %s3226_s26 }
  0x86   : > { %p3223_p13 = pnand %p3221_p1, %p3209_p2  ;;  %p3229_p12 = scmp.lt.s32.totalorder %s3227_s10, %s3220_s8 }
  0x88   : > { %p3224_p5 = pneg %p3223_p13  ;;  %p3230_p6 = por %p3229_p12, %p3228_p0 }
  0x8a   : > { %p3231_p8 = pnand %p3230_p6, %p3224_p5 }
  0x8c   : > { %3234 = shalt.err (!%p3231_p8)
}
  0x8d   : > { %2719 = dma.hbm_to_vmem [thread:$0]  (!%p3609_p7), %s3603_s29, 512, %s3605_s4, %s509_s12  }
  0x8e   : > { %s2400_s22 = sshll.u32 %s3347_s21, 7  ;;  %s3865_s16 = sshll.u32 %s3588_s17, 3 }
  0x8f   : > { %s3644_s27 = scalar_lea.hbm %s3815_s1, %s2400_s22  ;;  %s531_s8 = scalar_lea.vmem [#allocation5], %s3865_s16 }
  0x90   : > { %s538_s10 = sshll.u32 %s531_s8, 4  ;;  %s3866_s26 = sand.u32 1, %s3347_s21   ;;  %s539_s10 = int_to_ptr.vmem [resolvable:$true] %s538_s10 }
  0x91   : > { %s528_s0 = scalar_lea.sflag [#allocation6], %s3866_s26  ;;  %s3235_s23 = scalar_lea.hbm %s3644_s27, 128 }
  0x92   : > { %p3236_p1 = scmp.ne.s32.totalorder %s3644_s27, %s3235_s23  ;;  %s3240_s29 = scalar_lea.hbm %s3815_s1, 256 }
  0x93   : > { %p3241_p12 = scmp.lt.s32.totalorder %s3644_s27, %s3815_s1  ;;  %p3242_p0 = scmp.lt.s32.totalorder %s3240_s29, %s3235_s23 }
  0x94   : > { %p3238_p4 = pnand %p3236_p1, %p3209_p2 }
  0x95   : > { %p3243_p9 = por %p3242_p0, %p3241_p12 }
  0x96   : > { %p3239_p6 = pneg %p3238_p4 }
  0x98   : > { %p3244_p10 = pnand %p3243_p9, %p3239_p6 }
  0x9a   : > { %3247 = shalt.err (!%p3244_p10)
}
  0x9b   : > { %s3248_s28 = scalar_lea.vmem %s539_s10, 128  ;;  %s3362_s13 = smov [#allocation5]  }
  0x9c   : > { %p3249_p11 = scmp.ne.s32.totalorder %s539_s10, %s3248_s28  ;;  %s3253_s16 = sshll.u32 %s3362_s13, 4  ;;  %s3254_s16 = int_to_ptr.vmem [resolvable:$false] %s3253_s16 }
  0x9d   : > { %s3255_s8 = scalar_lea.vmem %s3254_s16, 256  ;;  %p3256_p8 = scmp.lt.s32.totalorder %s539_s10, %s3254_s16 }
  0x9e   : > { %p3251_p13 = pnand %p3249_p11, %p3209_p2  ;;  %p3257_p1 = scmp.lt.s32.totalorder %s3255_s8, %s3248_s28 }
  0xa0   : > { %p3252_p5 = pneg %p3251_p13  ;;  %p3258_p4 = por %p3257_p1, %p3256_p8 }
  0xa2   : > { %p3259_p3 = pnand %p3258_p4, %p3252_p5 }
  0xa4   : > { %3262 = shalt.err (!%p3259_p3)
}
  0xa5   : > { %2722 = dma.hbm_to_vmem [thread:$0]  (!%p3609_p7), %s3644_s27, 128, %s539_s10, %s528_s0  }
  0xa6   : > { %p3867_p6 = scmp.ne.s32.totalorder %s3847_s25, 0 }
  0xa7   : > { %s3671_s23 = sand.u32 (!%p3867_p6), 1, %s3339_s19   ;;  %p3868_p3 = scmp.ne.s32.totalorder (!%p3867_p6), %s3860_s11, 0 }
  0xa8   : > { %547 = sbr.rel (%p3867_p6) target bundleno = 1640 (0x668), region = 76  ;;  %s2402_s26 = sshll.u32 (!%p3867_p6), %s3671_s23, 5 }
  0xa9   : > { %s550_s4 = scalar_lea.sflag (!%p3867_p6), [#allocation3], %s3671_s23  ;;  %s3677_s12 = scalar_lea.vmem (!%p3867_p6), [#allocation2], %s2402_s26 }
  0xad   : > { %3306 = dma.done.wait (%p3868_p3), %s550_s4, 512  }
  0xae   : > { %3308 = vsyncadd (%p3868_p3), %s550_s4, 4294966784  ;;  %s558_s0 = sand.u32 1, %s3469_s24   ;;  %s2403_s6 = sshll.u32 %s3671_s23, 3 }
  0xaf   : > { %s559_s25 = scalar_lea.sflag [#allocation6], %s558_s0  ;;  %s3685_s27 = scalar_lea.vmem [#allocation5], %s2403_s6 }
  0xb0   : > { %3310 = dma.done.wait (%p3868_p3), %s559_s25, 128  }
  0xb1   : > { %3312 = vsyncadd (%p3868_p3), %s559_s25, 4294967168  ;;  %p3869_p7 = scmp.eq.s32.totalorder %s3469_s24, 0 }
  0xb3   : > { %3314 = dma.done.wait (%p3869_p7), [#allocation6], 8192   ;;  %p3870_p2 = pmov %p3869_p7 }
  0xb5   : > { %3316 = vsyncadd (%p3870_p2), [#allocation6], 4294959104  ;;  %p3871_p12 = pmov %p3870_p2 }
  0xb6   : > { %p3872_p0 = pmov %p3870_p2 }
  0xb7   : > { %3318 = dma.done.wait (%p3871_p12), [#allocation9], 3072  }
  0xb8   : > { %3320 = vsyncadd (%p3872_p0), [#allocation9], 4294964224  ;;  %p3873_p9 = pmov %p3872_p0 }
  0xb9   : > { %p3874_p10 = pmov %p3872_p0 }
  0xba   : > { %3322 = dma.done.wait (%p3873_p9), [#allocation12], 2560  }
  0xbb   : > { %3324 = vsyncadd (%p3874_p10), [#allocation12], 4294964736  ;;  %p3875_p11 = pmov %p3872_p0 }
  0xbc   : > { %p3876_p13 = pmov %p3872_p0 }
  0xbd   : > { %3326 = dma.done.wait (%p3875_p11), [#allocation15], 8192  }
  0xbe   : > { %3328 = vsyncadd (%p3876_p13), [#allocation15], 4294959104  ;;  %v2789_v0 = vld [vmem:[#allocation7 + $0x74] ss:$8 sps:$4 sm:$0xff]   ;;  %v2793_v2 = vld [vmem:[#allocation7 + $0x70] ss:$8 sps:$4 sm:$0xff]  }
  0xbf   : > { %v2791_v1 = vld [vmem:[#allocation7 + $0x174] ss:$8 sps:$4 sm:$0xff]   ;;  %1051 = vmatprep.subr.bf16.mxu0 %v2789_v0  ;;  %v2794_v3 = vld [vmem:[#allocation7 + $0x170] ss:$8 sps:$4 sm:$0xff]   ;;  %v2795_v4 = vld [vmem:[#allocation7 + $0x64] ss:$8 sps:$4 sm:$0xff]  }
  0xc0   : > { %1092 = vmatprep.subr.bf16.mxu1 %v2791_v1  ;;  %1052 = vmatpush1.bf16.msra.mxu0 %v2793_v2  ;;  %v2797_v5 = vld [vmem:[#allocation7 + $0x164] ss:$8 sps:$4 sm:$0xff]   ;;  %v2799_v6 = vld [vmem:[#allocation7 + $0x60] ss:$8 sps:$4 sm:$0xff]   ;;  %v2801_v8 = vld [vmem:[#allocation7 + $0x54] ss:$8 sps:$4 sm:$0xff]  }
  0xc1   : > { %1093 = vmatpush1.bf16.msra.mxu1 %v2794_v3  ;;  %1053 = vmatprep.subr.bf16.mxu0 %v2795_v4  ;;  %v2800_v7 = vld [vmem:[#allocation7 + $0x160] ss:$8 sps:$4 sm:$0xff]   ;;  %v2803_v9 = vld [vmem:[#allocation7 + $0x154] ss:$8 sps:$4 sm:$0xff]   ;;  %v2805_v10 = vld [vmem:[#allocation7 + $0x50] ss:$8 sps:$4 sm:$0xff]  }
  0xc2   : > { %1094 = vmatprep.subr.bf16.mxu1 %v2797_v5  ;;  %v2806_v11 = vld [vmem:[#allocation7 + $0x150] ss:$8 sps:$4 sm:$0xff]   ;;  %v2807_v12 = vld [vmem:[#allocation7 + $0x44] ss:$8 sps:$4 sm:$0xff]   ;;  %v2811_v14 = vld [vmem:[#allocation7 + $0x40] ss:$8 sps:$4 sm:$0xff]  }
  0xc3   : > { %v2809_v13 = vld [vmem:[#allocation7 + $0x144] ss:$8 sps:$4 sm:$0xff]   ;;  %v2812_v15 = vld [vmem:[#allocation7 + $0x140] ss:$8 sps:$4 sm:$0xff]   ;;  %v2813_v16 = vld [vmem:[#allocation7 + $0x34] ss:$8 sps:$4 sm:$0xff]  }
  0xc4   : > { %1054 = vmatpush1.bf16.msra.mxu0 %v2799_v6  ;;  %v2815_v17 = vld [vmem:[#allocation7 + $0x134] ss:$8 sps:$4 sm:$0xff]   ;;  %v2817_v18 = vld [vmem:[#allocation7 + $0x30] ss:$8 sps:$4 sm:$0xff]   ;;  %v2819_v20 = vld [vmem:[#allocation7 + $0x24] ss:$8 sps:$4 sm:$0xff]  }
  0xc5   : > { %1095 = vmatpush1.bf16.msra.mxu1 %v2800_v7  ;;  %1055 = vmatprep.subr.bf16.mxu0 %v2801_v8  ;;  %v2818_v19 = vld [vmem:[#allocation7 + $0x130] ss:$8 sps:$4 sm:$0xff]   ;;  %v2821_v21 = vld [vmem:[#allocation7 + $0x124] ss:$8 sps:$4 sm:$0xff]   ;;  %v2823_v22 = vld [vmem:[#allocation7 + $0x20] ss:$8 sps:$4 sm:$0xff]  }
  0xc6   : > { %1096 = vmatprep.subr.bf16.mxu1 %v2803_v9  ;;  %v2824_v23 = vld [vmem:[#allocation7 + $0x120] ss:$8 sps:$4 sm:$0xff]   ;;  %v2825_v24 = vld [vmem:[#allocation7 + $0x14] ss:$8 sps:$4 sm:$0xff]   ;;  %v2829_v26 = vld [vmem:[#allocation7 + $0x10] ss:$8 sps:$4 sm:$0xff]  }
  0xc7   : > { %v2827_v25 = vld [vmem:[#allocation7 + $0x114] ss:$8 sps:$4 sm:$0xff]   ;;  %v2830_v27 = vld [vmem:[#allocation7 + $0x110] ss:$8 sps:$4 sm:$0xff]   ;;  %v2831_v28 = vld [vmem:[#allocation7 + $0x4] ss:$8 sps:$4 sm:$0xff]  }
  0xc8   : > { %1056 = vmatpush1.bf16.msra.mxu0 %v2805_v10  ;;  %v2833_v29 = vld [vmem:[#allocation7 + $0x104] ss:$8 sps:$4 sm:$0xff]   ;;  %v2835_v30 = vld [vmem:[#allocation7] ss:$8 sps:$4 sm:$0xff]   ;;  %v2837_v32 = vld [vmem:[#allocation7 + $0xf4] ss:$8 sps:$4 sm:$0xff]  }
  0xc9   : > { %1097 = vmatpush1.bf16.msra.mxu1 %v2806_v11  ;;  %1057 = vmatprep.subr.bf16.mxu0 %v2807_v12  ;;  %v2836_v31 = vld [vmem:[#allocation7 + $0x100] ss:$8 sps:$4 sm:$0xff]   ;;  %v2839_v33 = vld [vmem:[#allocation7 + $0x1f4] ss:$8 sps:$4 sm:$0xff]   ;;  %v2841_v34 = vld [vmem:[#allocation7 + $0xf0] ss:$8 sps:$4 sm:$0xff]  }
  0xca   : > { %1098 = vmatprep.subr.bf16.mxu1 %v2809_v13  ;;  %v2842_v35 = vld [vmem:[#allocation7 + $0x1f0] ss:$8 sps:$4 sm:$0xff]   ;;  %v2843_v36 = vld [vmem:[#allocation7 + $0xe4] ss:$8 sps:$4 sm:$0xff]   ;;  %v2847_v38 = vld [vmem:[#allocation7 + $0xe0] ss:$8 sps:$4 sm:$0xff]  }
  0xcb   : > { %v2845_v37 = vld [vmem:[#allocation7 + $0x1e4] ss:$8 sps:$4 sm:$0xff]   ;;  %v2848_v39 = vld [vmem:[#allocation7 + $0x1e0] ss:$8 sps:$4 sm:$0xff]   ;;  %v2849_v40 = vld [vmem:[#allocation7 + $0xd4] ss:$8 sps:$4 sm:$0xff]  }
  0xcc   : > { %1058 = vmatpush1.bf16.msra.mxu0 %v2811_v14  ;;  %v2851_v41 = vld [vmem:[#allocation7 + $0x1d4] ss:$8 sps:$4 sm:$0xff]   ;;  %v2853_v42 = vld [vmem:[#allocation7 + $0xd0] ss:$8 sps:$4 sm:$0xff]   ;;  %v2855_v44 = vld [vmem:[#allocation7 + $0xc4] ss:$8 sps:$4 sm:$0xff]  }
  0xcd   : > { %1099 = vmatpush1.bf16.msra.mxu1 %v2812_v15  ;;  %1059 = vmatprep.subr.bf16.mxu0 %v2813_v16  ;;  %v2854_v43 = vld [vmem:[#allocation7 + $0x1d0] ss:$8 sps:$4 sm:$0xff]   ;;  %v2857_v45 = vld [vmem:[#allocation7 + $0x1c4] ss:$8 sps:$4 sm:$0xff]   ;;  %v2859_v47 = vld [vmem:[#allocation7 + $0xc0] ss:$8 sps:$4 sm:$0xff]  }
  0xce   : > { %1100 = vmatprep.subr.bf16.mxu1 %v2815_v17  ;;  %v648_v46 = vld [vmem:[%s3677_s12 + $0x8] sm:$0xff]  ;;  %v2860_v48 = vld [vmem:[#allocation7 + $0x1c0] ss:$8 sps:$4 sm:$0xff]   ;;  %v2867_v56 = vld [vmem:[#allocation7 + $0xa4] ss:$8 sps:$4 sm:$0xff]   ;;  %vm3364_vm0 = vmmov 0  }
  0xcf   : > { %v652_v49 = vpack.c.bf16 %v648_v46, %v648_v46  ;;  %v650_v50 = vld [vmem:[%s3677_s12 + $0x18] sm:$0xff]  ;;  %v2861_v51 = vld [vmem:[#allocation7 + $0xb4] ss:$8 sps:$4 sm:$0xff]   ;;  %v2865_v54 = vld [vmem:[#allocation7 + $0xb0] ss:$8 sps:$4 sm:$0xff]   ;;  %p642_p5 = scmp.lt.s32.totalorder %s3469_s24, 1 }
  0xd0   : > { %1060 = vmatpush1.bf16.msra.mxu0 %v2817_v18  ;;  %v654_v52 = vpack.c.bf16 %v650_v50, %v650_v50  ;;  %v2863_v53 = vld [vmem:[#allocation7 + $0x1b4] ss:$8 sps:$4 sm:$0xff]   ;;  %v2866_v55 = vld [vmem:[#allocation7 + $0x1b0] ss:$8 sps:$4 sm:$0xff]   ;;  %v2869_v57 = vld [vmem:[#allocation7 + $0x1a4] ss:$8 sps:$4 sm:$0xff]  }
  0xd1   : > { %1101 = vmatpush1.bf16.msra.mxu1 %v2818_v19  ;;  %1061 = vmatprep.subr.bf16.mxu0 %v2819_v20  ;;  %v2871_v58 = vld [vmem:[#allocation7 + $0xa0] ss:$8 sps:$4 sm:$0xff]   ;;  %v2873_v60 = vld [vmem:[#allocation7 + $0x94] ss:$8 sps:$4 sm:$0xff]   ;;  %v2877_v62 = vld [vmem:[#allocation7 + $0x90] ss:$8 sps:$4 sm:$0xff]  }
  0xd2   : > { %1102 = vmatprep.subr.bf16.mxu1 %v2821_v21  ;;  %1083 = vmatprep.mubr.bf16.mxu0 %v652_v49  ;;  %v2872_v59 = vld [vmem:[#allocation7 + $0x1a0] ss:$8 sps:$4 sm:$0xff]   ;;  %v2875_v61 = vld [vmem:[#allocation7 + $0x194] ss:$8 sps:$4 sm:$0xff]   ;;  %v2878_v63 = vld [vmem:[#allocation7 + $0x190] ss:$8 sps:$4 sm:$0xff]  }
  0xd3   : > { %1124 = vmatprep.mubr.bf16.mxu1 %v654_v52  ;;  %v2879_v0 = vld [vmem:[#allocation7 + $0x84] ss:$8 sps:$4 sm:$0xff]   ;;  %v2883_v2 = vld [vmem:[#allocation7 + $0x80] ss:$8 sps:$4 sm:$0xff]   ;;  %v647_v4 = vld [vmem:[%s3677_s12] sm:$0xff]  ;;  %s643_s17 = scalar_select %p642_p5, %s3469_s24, 1 }
  0xd4   : > { %1062 = vmatpush1.bf16.msra.mxu0 %v2823_v22  ;;  %v2881_v1 = vld [vmem:[#allocation7 + $0x184] ss:$8 sps:$4 sm:$0xff]   ;;  %v2884_v3 = vld [vmem:[#allocation7 + $0x180] ss:$8 sps:$4 sm:$0xff]   ;;  %v2885_v6 = vld [vmem:[#allocation8 + $0x78] sm:$0xff]   ;;  %v651_v8 = vpack.c.bf16 %v647_v4, %v647_v4  ;;  %s3365_s0 = smov 64  }
  0xd5   : > { %1103 = vmatpush1.bf16.msra.mxu1 %v2824_v23  ;;  %1063 = vmatprep.subr.bf16.mxu0 %v2825_v24  ;;  %v649_v5 = vld [vmem:[%s3677_s12 + $0x10] sm:$0xff]  ;;  %v2886_v7 = vld [vmem:[#allocation8 + $0x38] sm:$0xff]   ;;  %v2887_v10 = vld [vmem:[#allocation8 + $0x70] sm:$0xff]   ;;  %s2411_s28 = sshll.u32 %s643_s17, 3  ;;  %vm1475_vm1 = vcmask 523264   ;;  %s3877_s10 = sld [smem:[#allocation31_spill]] }
  0xd6   : > { %1104 = vmatprep.subr.bf16.mxu1 %v2827_v25  ;;  %v653_v9 = vpack.c.bf16 %v649_v5, %v649_v5  ;;  %v2888_v11 = vld [vmem:[#allocation8 + $0x30] sm:$0xff]   ;;  %v2889_v12 = vld [vmem:[#allocation8 + $0x68] sm:$0xff]   ;;  %v2891_v14 = vld [vmem:[#allocation8 + $0x60] sm:$0xff]   ;;  %v3363_v25 = vmov 0.0   ;;  %s645_s12 = scalar_lea.vmem %s3829_s15, %s2411_s28  ;;  %s3878_s17 = sld [smem:[#allocation33_spill]] }
  0xd7   : > { %v2890_v13 = vld [vmem:[#allocation8 + $0x28] sm:$0xff]   ;;  %v2892_v15 = vld [vmem:[#allocation8 + $0x20] sm:$0xff]   ;;  %v2893_v16 = vld [vmem:[#allocation8 + $0x58] sm:$0xff]   ;;  %s2598_s28 = sshll.u32 %s3469_s24, 9  ;;  %s635_s13 = scalar_lea.vmem [#allocation16], %s2402_s26 }
  0xd8   : > { %1064 = vmatpush1.bf16.msra.mxu0 %v2829_v26  ;;  %v2894_v17 = vld [vmem:[#allocation8 + $0x18] sm:$0xff]   ;;  %v2895_v18 = vld [vmem:[#allocation8 + $0x50] sm:$0xff]   ;;  %v2897_v20 = vld [vmem:[#allocation8 + $0x48] sm:$0xff]   ;;  %s2210_s16 = sshll.u32 %s635_s13, 4  ;;  %s2192_s24 = scalar_lea.sflag [#allocation4], %s3671_s23  ;;  %s3773_s16 = int_to_ptr.vmem [resolvable:$true] %s2210_s16 }
  0xd9   : > { %1105 = vmatpush1.bf16.msra.mxu1 %v2830_v27  ;;  %1065 = vmatprep.subr.bf16.mxu0 %v2831_v28  ;;  %v2896_v19 = vld [vmem:[#allocation8 + $0x10] sm:$0xff]   ;;  %v2898_v21 = vld [vmem:[#allocation8 + $0x8] sm:$0xff]   ;;  %v2899_v22 = vld [vmem:[#allocation8 + $0x40] sm:$0xff]   ;;  %s3263_s26 = scalar_lea.vmem %s3773_s16, 512  ;;  %p3880_p1 = scmp.ne.s32.totalorder %s3861_s14, 0 }
  0xda   : > { %1106 = vmatprep.subr.bf16.mxu1 %v2833_v29  ;;  %v2900_v23 = vld [vmem:[#allocation8] sm:$0xff]   ;;  %v2901_v24 = vld [vmem:[#allocation10 + $0x38] sm:$0xff]   ;;  %v2902_v26 = vld [vmem:[#allocation10 + $0x30] sm:$0xff]   ;;  %p3264_p8 = scmp.ne.s32.totalorder %s3773_s16, %s3263_s26  ;;  %s3367_s6 = smov [#allocation16]  }
  0xdb   : > { %v2903_v27 = vld [vmem:[#allocation10 + $0x28] sm:$0xff]   ;;  %v2904_v28 = vld [vmem:[#allocation10 + $0x20] sm:$0xff]   ;;  %v2905_v29 = vld [vmem:[#allocation10 + $0x18] sm:$0xff]   ;;  %s3267_s25 = sshll.u32 %s3367_s6, 4  ;;  %s3268_s25 = int_to_ptr.vmem [resolvable:$false] %s3267_s25 }
  0xdc   : > { %1066 = vmatpush1.bf16.msra.mxu0 %v2835_v30  ;;  %v721_v30 = vlaneseq  ;;  %p3265_p4 = pnand %p3264_p8, %p3880_p1  ;;  %p3270_p3 = scmp.lt.s32.totalorder %s3773_s16, %s3268_s25 }
  0xdd   : > { %1107 = vmatpush1.bf16.msra.mxu1 %v2836_v31  ;;  %1067 = vmatprep.subr.bf16.mxu0 %v2837_v32 }
  0xde   : > { %1108 = vmatprep.subr.bf16.mxu1 %v2839_v33  ;;  %v3718_v31 = vshrl.u32 %v721_v30, 7  ;;  %v719_v33 = vld [vmem:[%s3817_s3] sm:$0x3]  ;;  %p3266_p6 = pneg %p3265_p4 }
  0xe0   : > { %1068 = vmatpush2.bf16.msra.mxu0 %v2841_v34  ;;  %v3721_v32 = vsub.s32 0, %v3718_v31  ;;  %v3727_v34 = vsub.s32 1, %v3718_v31 }
  0xe1   : > { %1109 = vmatpush2.bf16.msra.mxu1 %v2842_v35  ;;  %1069 = vmatprep.subr.bf16.mxu0 %v2843_v36 }
  0xe2   : > { %1110 = vmatprep.subr.bf16.mxu1 %v2845_v37  ;;  %v724_v35 = vrot.slane %v719_v33, %v3721_v32  ;;  %v728_v36 = vrot.slane %v719_v33, %v3727_v34 }
  0xe4   : > { %1070 = vmatpush2.bf16.msra.mxu0 %v2847_v38 }
  0xe5   : > { %1111 = vmatpush2.bf16.msra.mxu1 %v2848_v39  ;;  %1071 = vmatprep.subr.bf16.mxu0 %v2849_v40 }
  0xe6   : > { %1112 = vmatprep.subr.bf16.mxu1 %v2851_v41 }
  0xe8   : > { %1072 = vmatpush2.bf16.msra.mxu0 %v2853_v42 }
  0xe9   : > { %1113 = vmatpush2.bf16.msra.mxu1 %v2854_v43  ;;  %1073 = vmatprep.subr.bf16.mxu0 %v2855_v44 }
  0xea   : > { %1114 = vmatprep.subr.bf16.mxu1 %v2857_v45 }
  0xec   : > { %1074 = vmatpush2.bf16.msra.mxu0 %v2859_v47 }
  0xed   : > { %1115 = vmatpush2.bf16.msra.mxu1 %v2860_v48  ;;  %1075 = vmatprep.subr.bf16.mxu0 %v2861_v51 }
  0xee   : > { %1116 = vmatprep.subr.bf16.mxu1 %v2863_v53  ;;  %v2906_v53 = vld [vmem:[#allocation10 + $0x10] sm:$0xff]  }
  0xf0   : > { %1076 = vmatpush2.bf16.msra.mxu0 %v2865_v54  ;;  %v2907_v54 = vld [vmem:[#allocation10 + $0x8] sm:$0xff]  }
  0xf1   : > { %1117 = vmatpush2.bf16.msra.mxu1 %v2866_v55  ;;  %1077 = vmatprep.subr.bf16.mxu0 %v2867_v56  ;;  %v2908_v55 = vld [vmem:[#allocation10] sm:$0xff]  }
  0xf2   : > { %1118 = vmatprep.subr.bf16.mxu1 %v2869_v57  ;;  %v2476_v57 = vld [vmem:[%s3819_s5] ss:$0 sm:$0xff] }
  0xf4   : > { %1078 = vmatpush2.bf16.msra.mxu0 %v2871_v58 }
  0xf5   : > { %1119 = vmatpush2.bf16.msra.mxu1 %v2872_v59  ;;  %1079 = vmatprep.subr.bf16.mxu0 %v2873_v60 }
  0xf6   : > { %1120 = vmatprep.subr.bf16.mxu1 %v2875_v61 }
  0xf8   : > { %1080 = vmatpush2.bf16.msra.mxu0 %v2877_v62 }
  0xf9   : > { %1121 = vmatpush2.bf16.msra.mxu1 %v2878_v63  ;;  %1081 = vmatprep.subr.bf16.mxu0 %v2879_v0 }
  0xfa   : > { %1122 = vmatprep.subr.bf16.mxu1 %v2881_v1  ;;  %v2909_v1 = vld [vmem:[#allocation11 + $0x18] sm:$0xff]  }
  0xfc   : > { %1082 = vmatpush2.bf16.msra.mxu0 %v2883_v2  ;;  %v2910_v2 = vld [vmem:[#allocation11 + $0x10] sm:$0xff]  }
  0xfd   : > { %1123 = vmatpush2.bf16.msra.mxu1 %v2884_v3  ;;  %2599 = vmatprep.subr.bf16.mxu0 %v2885_v6  ;;  %v2493_v3 = vld [vmem:[%s3821_s7] ss:$0 sm:$0xff] }
  0xfe   : > { %2635 = vmatprep.subr.bf16.mxu1 %v3363_v25 }
  0xff   : > { %1084 = vmatmul.mubr.bf16.vlgmr.msra.gmra.mxu0 %v651_v8 }
 0x100   : > { %1125 = vmatmul.mubr.bf16.vlgmr.msra.gmra.mxu1 %v653_v9  ;;  %2600 = vmatpush3.bf16.msra.mxu0 %v2886_v7 }
 0x101   : > { %2601 = vmatprep.subr.bf16.mxu0 %v2887_v10  ;;  %2636 = vmatpush3.bf16.msra.mxu1 %v2901_v24  ;;  %v2911_v10 = vld [vmem:[#allocation11 + $0x8] sm:$0xff]  }
 0x102   : > { %2637 = vmatprep.subr.bf16.mxu1 %v3363_v25  ;;  %2651 = vmatprep.mubr.msk.bf16.mxu1 %vm3364_vm0, %v3363_v25  ;;  %v2930_v24 = vld [vmem:[#allocation13 + $0x24] ss:$8 sps:$4 sm:$0xff]  }
 0x104   : > { %2602 = vmatpush3.bf16.msra.mxu0 %v2888_v11 }
 0x105   : > { %2603 = vmatprep.subr.bf16.mxu0 %v2889_v12  ;;  %2638 = vmatpush3.bf16.msra.mxu1 %v2902_v26  ;;  %v2912_v12 = vld [vmem:[#allocation11] sm:$0xff]   ;;  %v2933_v26 = vld [vmem:[#allocation13 + $0x14] ss:$8 sps:$4 sm:$0xff]  }
 0x106   : > { %2639 = vmatprep.subr.bf16.mxu1 %v3363_v25 }
 0x108   : > { %2604 = vmatpush3.bf16.msra.mxu0 %v2890_v13  ;;  %v2913_v13 = vld [vmem:[#allocation13 + $0x70] ss:$8 sps:$4 sm:$0xff]  }
 0x109   : > { %2605 = vmatprep.subr.bf16.mxu0 %v2891_v14  ;;  %2640 = vmatpush3.bf16.msra.mxu1 %v2903_v27  ;;  %v2915_v14 = vld [vmem:[#allocation13 + $0x74] ss:$8 sps:$4 sm:$0xff]   ;;  %v2931_v27 = vld [vmem:[#allocation13 + $0x10] ss:$8 sps:$4 sm:$0xff]  }
 0x10a   : > { %2641 = vmatprep.subr.bf16.mxu1 %v3363_v25 }
 0x10c   : > { %2606 = vmatpush3.bf16.msra.mxu0 %v2892_v15  ;;  %v2918_v15 = vld [vmem:[#allocation13 + $0x64] ss:$8 sps:$4 sm:$0xff]  }
 0x10d   : > { %2607 = vmatprep.subr.bf16.mxu0 %v2893_v16  ;;  %2642 = vmatpush3.bf16.msra.mxu1 %v2904_v28  ;;  %v2916_v16 = vld [vmem:[#allocation13 + $0x60] ss:$8 sps:$4 sm:$0xff]   ;;  %v1425_v28 = vld [vmem:[%s3685_s27] sm:$0xff]  ;;  %s3269_s27 = scalar_lea.vmem %s3268_s25, 1024 }
 0x10e   : > { %2643 = vmatprep.subr.bf16.mxu1 %v3363_v25  ;;  %p3271_p7 = scmp.lt.s32.totalorder %s3269_s27, %s3263_s26 }
 0x110   : > { %2608 = vmatpush3.bf16.msra.mxu0 %v2894_v17  ;;  %v2921_v17 = vld [vmem:[#allocation13 + $0x54] ss:$8 sps:$4 sm:$0xff]   ;;  %p3272_p2 = por %p3271_p7, %p3270_p3 }
 0x111   : > { %2609 = vmatprep.subr.bf16.mxu0 %v2895_v18  ;;  %2644 = vmatpush3.bf16.msra.mxu1 %v2905_v29 }
 0x112   : > { %2645 = vmatprep.subr.bf16.mxu1 %v3363_v25  ;;  %p3273_p12 = pnand %p3272_p2, %p3266_p6 }
 0x114   : > { %2610 = vmatpush3.bf16.msra.mxu0 %v2896_v19  ;;  %v2919_v19 = vld [vmem:[#allocation13 + $0x50] ss:$8 sps:$4 sm:$0xff]  }
 0x115   : > { %2611 = vmatprep.subr.bf16.mxu0 %v2897_v20  ;;  %2646 = vmatpush3.bf16.msra.mxu1 %v2906_v53  ;;  %v2924_v20 = vld [vmem:[#allocation13 + $0x44] ss:$8 sps:$4 sm:$0xff]   ;;  %v2973_v53 = vld [vmem:[#allocation14 + $0x20] ss:$16 sps:$4 sm:$0xff]  }
 0x116   : > { %2647 = vmatprep.subr.bf16.mxu1 %v3363_v25 }
 0x118   : > { %2612 = vmatpush3.bf16.msra.mxu0 %v2898_v21  ;;  %v2922_v21 = vld [vmem:[#allocation13 + $0x40] ss:$8 sps:$4 sm:$0xff]  }
 0x119   : > { %2613 = vmatprep.subr.bf16.mxu0 %v2899_v22  ;;  %2648 = vmatpush3.bf16.msra.mxu1 %v2907_v54  ;;  %v2927_v22 = vld [vmem:[#allocation13 + $0x34] ss:$8 sps:$4 sm:$0xff]  }
 0x11a   : > { %2649 = vmatprep.subr.bf16.mxu1 %v3363_v25  ;;  %v2981_v54 = vld [vmem:[#allocation14 + $0x4] ss:$16 sps:$4 sm:$0xff]  }
 0x11c   : > { %2614 = vmatpush3.bf16.msra.mxu0 %v2900_v23  ;;  %v2925_v23 = vld [vmem:[#allocation13 + $0x30] ss:$8 sps:$4 sm:$0xff]  }
 0x11d   : > { %2655 = vmatprep.subr.bf16.mxu0 %v3363_v25  ;;  %2650 = vmatpush3.bf16.msra.mxu1 %v2908_v55  ;;  %v2979_v55 = vld [vmem:[#allocation14] ss:$16 sps:$4 sm:$0xff]  }
 0x11e   : > { %1629 = vmatprep.subr.bf16.mxu1 %v2915_v14  ;;  %v2946_v14 = vld [vmem:[#allocation14 + $0xc8] ss:$16 sps:$4 sm:$0xff]  }
 0x1bf   : > { %v1085_v37 = vpop.f32.mrf.mxu0 }
 0x1c0   : > { %v1126_v38 = vpop.f32.mrf.mxu1  ;;  %v1086_v39 = vadd.f32 %v1085_v37, %v724_v35  ;;  %v2934_v37 = vld [vmem:[#allocation13] ss:$8 sps:$4 sm:$0xff]  }
 0x1c1   : > { %v1087_v40 = vpop.f32.mrf.mxu0 }
 0x1c2   : > { %v1128_v41 = vpop.f32.mrf.mxu1  ;;  %v1127_v42 = vadd.f32 %v1126_v38, %v1086_v39  ;;  %v1088_v43 = vadd.f32 %v1087_v40, %v728_v36  ;;  %v2936_v36 = vld [vmem:[#allocation13 + $0x4] ss:$8 sps:$4 sm:$0xff]   ;;  %v3366_v38 = vmov 0   ;;  %v2937_v39 = vld [vmem:[#allocation14 + $0xe0] ss:$16 sps:$4 sm:$0xff]  }
 0x1c3   : > { %v1089_v44 = vpop.f32.mrf.mxu0  ;;  %v2939_v40 = vld [vmem:[#allocation14 + $0xe4] ss:$16 sps:$4 sm:$0xff]  }
 0x1c4   : > { %v1130_v45 = vpop.f32.mrf.mxu1  ;;  %v1129_v46 = vadd.f32 %v1128_v41, %v1088_v43  ;;  %v1133_v47 = vmax.f32 %v1127_v42, 0.0  ;;  %v2942_v41 = vld [vmem:[#allocation14 + $0xec] ss:$16 sps:$4 sm:$0xff]   ;;  %v2945_v42 = vld [vmem:[#allocation14 + $0xc4] ss:$16 sps:$4 sm:$0xff]  }
 0x1c5   : > { %v1090_v48 = vpop.f32.mrf.mxu0  ;;  %v2943_v43 = vld [vmem:[#allocation14 + $0xc0] ss:$16 sps:$4 sm:$0xff]   ;;  %v2951_v44 = vld [vmem:[#allocation14 + $0xa4] ss:$16 sps:$4 sm:$0xff]  }
 0x1c6   : > { %v1131_v49 = vpop.f32.mrf.mxu1  ;;  %v1134_v50 = vmax.f32 %v1129_v46, 0.0  ;;  %v1135_v52 = vpack.c.bf16 %v1133_v47, %v1133_v47  ;;  %v2949_v45 = vld [vmem:[#allocation14 + $0xa0] ss:$16 sps:$4 sm:$0xff]   ;;  %v2957_v46 = vld [vmem:[#allocation14 + $0x84] ss:$16 sps:$4 sm:$0xff]  }
 0x1c7   : > { %v2955_v47 = vld [vmem:[#allocation14 + $0x80] ss:$16 sps:$4 sm:$0xff]   ;;  %v2963_v48 = vld [vmem:[#allocation14 + $0x64] ss:$16 sps:$4 sm:$0xff]  }
 0x1c8   : > { %v1136_v51 = vpack.c.bf16 %v1134_v50, %v1134_v50  ;;  %v2961_v49 = vld [vmem:[#allocation14 + $0x60] ss:$16 sps:$4 sm:$0xff]   ;;  %v2969_v50 = vld [vmem:[#allocation14 + $0x44] ss:$16 sps:$4 sm:$0xff]  }
 0x1ca   : > { %1304 = vmatprep.mubr.bf16.mxu0 %v1136_v51  ;;  %v2967_v51 = vld [vmem:[#allocation14 + $0x40] ss:$16 sps:$4 sm:$0xff]  }
 0x1cb   : > { %1305 = vmatmul.mubr.bf16.vlgmr.msra.gmra.mxu0 %v1135_v52  ;;  %v2975_v52 = vld [vmem:[#allocation14 + $0x24] ss:$16 sps:$4 sm:$0xff]  }
 0x1cc   : > { %2663 = vmatprep.mubr.msk.bf16.mxu0 %vm3364_vm0, %v3363_v25  ;;  %2656 = vmatpush3.bf16.msra.mxu0 %v2909_v1  ;;  %v3009_v1 = vld [vmem:[#allocation14 + $0x160] ss:$16 sps:$4 sm:$0xff]  }
 0x1cd   : > { %2657 = vmatprep.subr.bf16.mxu0 %v3363_v25 }
 0x1d0   : > { %2658 = vmatpush3.bf16.msra.mxu0 %v2910_v2  ;;  %v3017_v2 = vld [vmem:[#allocation14 + $0x144] ss:$16 sps:$4 sm:$0xff]  }
 0x1d1   : > { %2659 = vmatprep.subr.bf16.mxu0 %v3363_v25 }
 0x1d4   : > { %2660 = vmatpush3.bf16.msra.mxu0 %v2911_v10  ;;  %v2940_v10 = vld [vmem:[#allocation14 + $0xe8] ss:$16 sps:$4 sm:$0xff]  }
 0x1d5   : > { %2661 = vmatprep.subr.bf16.mxu0 %v3363_v25  ;;  %v2928_v25 = vld [vmem:[#allocation13 + $0x20] ss:$8 sps:$4 sm:$0xff]  }
 0x1d8   : > { %2662 = vmatpush3.bf16.msra.mxu0 %v2912_v12  ;;  %v2948_v12 = vld [vmem:[#allocation14 + $0xcc] ss:$16 sps:$4 sm:$0xff]  }
 0x1d9   : > { %2080 = vmatprep.subr.bf16.mxu0 %v2939_v40  ;;  %v3020_v40 = vld [vmem:[#allocation14 + $0x14c] ss:$16 sps:$4 sm:$0xff]  }
 0x28b   : > { %v2615_v56 = vpop.f32.mrf.mxu0 }
 0x28d   : > { %v2616_v58 = vpop.f32.mrf.mxu0 }
 0x28e   : > { %v2617_v59 = vadd.f32 %v2616_v58, %v2615_v56  ;;  %v2987_v56 = vld [vmem:[#allocation14 + $0x1e4] ss:$16 sps:$4 sm:$0xff]  }
 0x28f   : > { %v2618_v60 = vpop.f32.mrf.mxu0  ;;  %v2993_v58 = vld [vmem:[#allocation14 + $0x1c4] ss:$16 sps:$4 sm:$0xff]  }
 0x290   : > { %v1307_v61 = vadd.f32 %v2617_v59, %v2476_v57  ;;  %v2985_v57 = vld [vmem:[#allocation14 + $0x1e0] ss:$16 sps:$4 sm:$0xff]   ;;  %v2999_v60 = vld [vmem:[#allocation14 + $0x1a4] ss:$16 sps:$4 sm:$0xff]  }
 0x291   : > { %v2619_v62 = vpop.f32.mrf.mxu0  ;;  %v2991_v59 = vld [vmem:[#allocation14 + $0x1c0] ss:$16 sps:$4 sm:$0xff]  }
 0x292   : > { %v1312_v63 = vmax.f32 %v1307_v61, 0.0  ;;  %v2997_v61 = vld [vmem:[#allocation14 + $0x1a0] ss:$16 sps:$4 sm:$0xff]   ;;  %v3005_v62 = vld [vmem:[#allocation14 + $0x184] ss:$16 sps:$4 sm:$0xff]  }
 0x294   : > { %v1313_v0 = vpack.c.bf16 %v1312_v63, %v1312_v63  ;;  %v3003_v63 = vld [vmem:[#allocation14 + $0x180] ss:$16 sps:$4 sm:$0xff]  }
 0x296   : > { %2652 = vmatmul.mubr.bf16.vlgmr.msra.gmra.mxu1 %v1313_v0  ;;  %v3011_v0 = vld [vmem:[#allocation14 + $0x164] ss:$16 sps:$4 sm:$0xff]  }
 0x297   : > { %1630 = vmatpush1.bf16.msra.mxu1 %v2913_v13  ;;  %1661 = vmatprep.mubr.bf16.mxu1 %v3366_v38  ;;  %v3014_v38 = vld [vmem:[#allocation14 + $0x16c] ss:$16 sps:$4 sm:$0xff]  }
 0x298   : > { %1631 = vmatprep.subr.bf16.mxu1 %v2918_v15  ;;  %v2954_v15 = vld [vmem:[#allocation14 + $0xac] ss:$16 sps:$4 sm:$0xff]  }
 0x29b   : > { %1632 = vmatpush1.bf16.msra.mxu1 %v2916_v16  ;;  %v2952_v16 = vld [vmem:[#allocation14 + $0xa8] ss:$16 sps:$4 sm:$0xff]  }
 0x29c   : > { %1633 = vmatprep.subr.bf16.mxu1 %v2921_v17  ;;  %v2960_v17 = vld [vmem:[#allocation14 + $0x8c] ss:$16 sps:$4 sm:$0xff]  }
 0x29f   : > { %1634 = vmatpush1.bf16.msra.mxu1 %v2919_v19  ;;  %v2966_v19 = vld [vmem:[#allocation14 + $0x6c] ss:$16 sps:$4 sm:$0xff]  }
 0x2a0   : > { %1635 = vmatprep.subr.bf16.mxu1 %v2924_v20  ;;  %v2964_v20 = vld [vmem:[#allocation14 + $0x68] ss:$16 sps:$4 sm:$0xff]  }
 0x2a3   : > { %1636 = vmatpush1.bf16.msra.mxu1 %v2922_v21  ;;  %v2972_v21 = vld [vmem:[#allocation14 + $0x4c] ss:$16 sps:$4 sm:$0xff]  }
 0x2a4   : > { %1637 = vmatprep.subr.bf16.mxu1 %v2927_v22  ;;  %v2970_v22 = vld [vmem:[#allocation14 + $0x48] ss:$16 sps:$4 sm:$0xff]  }
 0x2a7   : > { %1638 = vmatpush1.bf16.msra.mxu1 %v2925_v23  ;;  %v2978_v23 = vld [vmem:[#allocation14 + $0x2c] ss:$16 sps:$4 sm:$0xff]  }
 0x2a8   : > { %1639 = vmatprep.subr.bf16.mxu1 %v2930_v24  ;;  %v2976_v24 = vld [vmem:[#allocation14 + $0x28] ss:$16 sps:$4 sm:$0xff]  }
 0x2ab   : > { %1640 = vmatpush1.bf16.msra.mxu1 %v2928_v25  ;;  %v2984_v25 = vld [vmem:[#allocation14 + $0xc] ss:$16 sps:$4 sm:$0xff]  }
 0x2ac   : > { %1641 = vmatprep.subr.bf16.mxu1 %v2933_v26  ;;  %v2982_v26 = vld [vmem:[#allocation14 + $0x8] ss:$16 sps:$4 sm:$0xff]  }
 0x2af   : > { %1642 = vmatpush1.bf16.msra.mxu1 %v2931_v27  ;;  %v2990_v27 = vld [vmem:[#allocation14 + $0x1ec] ss:$16 sps:$4 sm:$0xff]  }
 0x2b0   : > { %1643 = vmatprep.subr.bf16.mxu1 %v2936_v36  ;;  %v3008_v36 = vld [vmem:[#allocation14 + $0x18c] ss:$16 sps:$4 sm:$0xff]  }
 0x2b3   : > { %1644 = vmatpush1.bf16.msra.mxu1 %v2934_v37  ;;  %v3006_v37 = vld [vmem:[#allocation14 + $0x188] ss:$16 sps:$4 sm:$0xff]  }
 0x2b4   : > { %2121 = vmatprep.subr.bf16.mxu1 %v2942_v41  ;;  %v3018_v41 = vld [vmem:[#allocation14 + $0x148] ss:$16 sps:$4 sm:$0xff]  }
 0x356   : > { %v1419_v4 = vpop.f32.mrf.mxu1 }
 0x357   : > { %v1420_v5 = vadd.f32 %v2493_v3, %v1419_v4  ;;  %v3015_v3 = vld [vmem:[#allocation14 + $0x140] ss:$16 sps:$4 sm:$0xff]  }
 0x358   : > { %v2653_v6 = vpop.f32.mrf.mxu1  ;;  %v2502_v4 = vld [vmem:[%s3823_s9] ss:$0 sm:$0xff] }
 0x359   : > { %v1426_v7 = vmul.f32 0.5, %v1420_v5  ;;  %2190 = vst [vmem:[%s645_s12] sm:$0xff] %v1420_v5  ;;  %s3879_s12 = sld [smem:[#allocation34_spill]] }
 0x35a   : > { %v1422_v8 = vpop.f32.mrf.mxu1 }
 0x35b   : > { %v1427_v9 = vmul.f32 1.442695, %v1426_v7 }
 0x35c   : > { %v2654_v11 = vpop.f32.mrf.mxu1 }
 0x35d   : > { %3033 = vpow2.f32 %v1427_v9 }
 0x36a   : > { %v3034_v18 = vpop.eup %3033 }
 0x36b   : > { %1430 = vrot.lane.b32.xlu0 %v3034_v18, %s3365_s0  ;;  %v2958_v18 = vld [vmem:[#allocation14 + $0x88] ss:$16 sps:$4 sm:$0xff]   ;;  %s3771_s0 = scalar_lea.hbm %s3879_s12, %s2598_s28 }
 0x3dd   : > { %v1431_v29 = vpop.permute.xlu0 %1430 }
 0x3de   : > { %v1433_v30 = vmul.f32 %v1431_v29, %v1425_v28  ;;  %v2988_v28 = vld [vmem:[#allocation14 + $0x1e8] ss:$16 sps:$4 sm:$0xff]   ;;  %v2996_v29 = vld [vmem:[#allocation14 + $0x1cc] ss:$16 sps:$4 sm:$0xff]  }
 0x3e0   : > { %v1434_v33 = vadd.f32 %v1433_v30, %v1420_v5  ;;  %v2994_v30 = vld [vmem:[#allocation14 + $0x1c8] ss:$16 sps:$4 sm:$0xff]  }
 0x3e2   : > { %v1435_v35 = vpack.c.bf16 %v1434_v33, %v1434_v33  ;;  %v3002_v33 = vld [vmem:[#allocation14 + $0x1ac] ss:$16 sps:$4 sm:$0xff]  }
 0x3e4   : > { %2664 = vmatmul.mubr.msk.bf16.vlgmr.msra.gmra.mxu0 %vm1475_vm1, %v1435_v35  ;;  %v3000_v35 = vld [vmem:[#allocation14 + $0x1a8] ss:$16 sps:$4 sm:$0xff]  }
 0x3e5   : > { %2081 = vmatpush1.bf16.msra.mxu0 %v2937_v39  ;;  %v3012_v39 = vld [vmem:[#allocation14 + $0x168] ss:$16 sps:$4 sm:$0xff]  }
 0x3e6   : > { %2082 = vmatprep.subr.bf16.mxu0 %v2945_v42  ;;  %v3023_v42 = vld [vmem:[#allocation14 + $0x124] ss:$16 sps:$4 sm:$0xff]  }
 0x3e9   : > { %2083 = vmatpush1.bf16.msra.mxu0 %v2943_v43  ;;  %v3026_v43 = vld [vmem:[#allocation14 + $0x12c] ss:$16 sps:$4 sm:$0xff]  }
 0x3ea   : > { %2084 = vmatprep.subr.bf16.mxu0 %v2951_v44  ;;  %v3021_v44 = vld [vmem:[#allocation14 + $0x120] ss:$16 sps:$4 sm:$0xff]  }
 0x3ed   : > { %2085 = vmatpush1.bf16.msra.mxu0 %v2949_v45  ;;  %v3024_v45 = vld [vmem:[#allocation14 + $0x128] ss:$16 sps:$4 sm:$0xff]  }
 0x3ee   : > { %2086 = vmatprep.subr.bf16.mxu0 %v2957_v46  ;;  %v3029_v46 = vld [vmem:[#allocation14 + $0x104] ss:$16 sps:$4 sm:$0xff]  }
 0x3f1   : > { %2087 = vmatpush1.bf16.msra.mxu0 %v2955_v47  ;;  %v3032_v47 = vld [vmem:[#allocation14 + $0x10c] ss:$16 sps:$4 sm:$0xff]  }
 0x3f2   : > { %2088 = vmatprep.subr.bf16.mxu0 %v2963_v48  ;;  %v3027_v48 = vld [vmem:[#allocation14 + $0x100] ss:$16 sps:$4 sm:$0xff]  }
 0x3f5   : > { %2089 = vmatpush1.bf16.msra.mxu0 %v2961_v49  ;;  %v3030_v49 = vld [vmem:[#allocation14 + $0x108] ss:$16 sps:$4 sm:$0xff]  }
 0x3f6   : > { %2090 = vmatprep.subr.bf16.mxu0 %v2969_v50  ;;  %v1537_v50 = vld [vmem:[%s3877_s10] sm:$0x3] }
 0x3f9   : > { %2091 = vmatpush1.bf16.msra.mxu0 %v2967_v51  ;;  %v1542_v51 = vrot.slane %v1537_v50, %v3721_v32 }
 0x3fa   : > { %2092 = vmatprep.subr.bf16.mxu0 %v2975_v52  ;;  %v1546_v52 = vrot.slane %v1537_v50, %v3727_v34 }
 0x3fd   : > { %2093 = vmatpush1.bf16.msra.mxu0 %v2973_v53 }
 0x3fe   : > { %2094 = vmatprep.subr.bf16.mxu0 %v2981_v54 }
 0x401   : > { %2095 = vmatpush1.bf16.msra.mxu0 %v2979_v55 }
 0x402   : > { %2096 = vmatprep.subr.bf16.mxu0 %v2987_v56 }
 0x405   : > { %2097 = vmatpush2.bf16.msra.mxu0 %v2985_v57 }
 0x406   : > { %2098 = vmatprep.subr.bf16.mxu0 %v2993_v58 }
 0x409   : > { %2099 = vmatpush2.bf16.msra.mxu0 %v2991_v59 }
 0x40a   : > { %2100 = vmatprep.subr.bf16.mxu0 %v2999_v60 }
 0x40d   : > { %2101 = vmatpush2.bf16.msra.mxu0 %v2997_v61 }
 0x40e   : > { %2102 = vmatprep.subr.bf16.mxu0 %v3005_v62 }
 0x411   : > { %2103 = vmatpush2.bf16.msra.mxu0 %v3003_v63  ;;  %v1750_v63 = vsub.s32 2, %v3718_v31 }
 0x412   : > { %2104 = vmatprep.subr.bf16.mxu0 %v3011_v0  ;;  %v1738_v0 = vld [vmem:[%s3878_s17] sm:$0xf] }
 0x415   : > { %2105 = vmatpush2.bf16.msra.mxu0 %v3009_v1  ;;  %v1754_v1 = vsub.s32 3, %v3718_v31 }
 0x416   : > { %2106 = vmatprep.subr.bf16.mxu0 %v3017_v2  ;;  %v1743_v2 = vrot.slane %v1738_v0, %v3721_v32 }
 0x419   : > { %2107 = vmatpush2.bf16.msra.mxu0 %v3015_v3  ;;  %v1751_v3 = vrot.slane %v1738_v0, %v1750_v63 }
 0x41a   : > { %2108 = vmatprep.subr.bf16.mxu0 %v3023_v42 }
 0x41d   : > { %2109 = vmatpush2.bf16.msra.mxu0 %v3021_v44 }
 0x41e   : > { %2110 = vmatprep.subr.bf16.mxu0 %v3029_v46 }
 0x421   : > { %2111 = vmatpush2.bf16.msra.mxu0 %v3027_v48 }
 0x4a4   : > { %v1513_v5 = vpop.f32.mrf.mxu0 }
 0x4a5   : > { %v1514_v6 = vadd.f32 %v2502_v4, %v1513_v5  ;;  %v1747_v4 = vrot.slane %v1738_v0, %v3727_v34  ;;  %v1755_v5 = vrot.slane %v1738_v0, %v1754_v1 }
 0x4a6   : > { %v2665_v7 = vpop.f32.mrf.mxu0 }
 0x4a7   : > { %v1519_v8 = vmax.f32 %v1514_v6, 0.0 }
 0x4a8   : > { %v1516_v9 = vpop.f32.mrf.mxu0 }
 0x4a9   : > { %v1520_v11 = vpack.c.bf16 %v1519_v8, %v1519_v8 }
 0x4aa   : > { %v2666_v13 = vpop.f32.mrf.mxu0 }
 0x4ab   : > { %1662 = vmatmul.mubr.bf16.vlgmr.msra.gmra.mxu1 %v1520_v11 }
 0x4ac   : > { %2122 = vmatpush1.bf16.msra.mxu1 %v2940_v10 }
 0x4ad   : > { %2123 = vmatprep.subr.bf16.mxu1 %v2948_v12 }
 0x4b0   : > { %2124 = vmatpush1.bf16.msra.mxu1 %v2946_v14 }
 0x4b1   : > { %2125 = vmatprep.subr.bf16.mxu1 %v2954_v15 }
 0x4b4   : > { %2126 = vmatpush1.bf16.msra.mxu1 %v2952_v16 }
 0x4b5   : > { %2127 = vmatprep.subr.bf16.mxu1 %v2960_v17 }
 0x4b8   : > { %2128 = vmatpush1.bf16.msra.mxu1 %v2958_v18 }
 0x4b9   : > { %2129 = vmatprep.subr.bf16.mxu1 %v2966_v19 }
 0x4bc   : > { %2130 = vmatpush1.bf16.msra.mxu1 %v2964_v20 }
 0x4bd   : > { %2131 = vmatprep.subr.bf16.mxu1 %v2972_v21 }
 0x4c0   : > { %2132 = vmatpush1.bf16.msra.mxu1 %v2970_v22 }
 0x4c1   : > { %2133 = vmatprep.subr.bf16.mxu1 %v2978_v23 }
 0x4c4   : > { %2134 = vmatpush1.bf16.msra.mxu1 %v2976_v24 }
 0x4c5   : > { %2135 = vmatprep.subr.bf16.mxu1 %v2984_v25 }
 0x4c8   : > { %2136 = vmatpush1.bf16.msra.mxu1 %v2982_v26 }
 0x4c9   : > { %2137 = vmatprep.subr.bf16.mxu1 %v2990_v27 }
 0x4cc   : > { %2138 = vmatpush2.bf16.msra.mxu1 %v2988_v28 }
 0x4cd   : > { %2139 = vmatprep.subr.bf16.mxu1 %v2996_v29 }
 0x4d0   : > { %2140 = vmatpush2.bf16.msra.mxu1 %v2994_v30 }
 0x4d1   : > { %2141 = vmatprep.subr.bf16.mxu1 %v3002_v33 }
 0x4d4   : > { %2142 = vmatpush2.bf16.msra.mxu1 %v3000_v35 }
 0x4d5   : > { %2143 = vmatprep.subr.bf16.mxu1 %v3008_v36 }
 0x4d8   : > { %2144 = vmatpush2.bf16.msra.mxu1 %v3006_v37 }
 0x4d9   : > { %2145 = vmatprep.subr.bf16.mxu1 %v3014_v38 }
 0x4dc   : > { %2146 = vmatpush2.bf16.msra.mxu1 %v3012_v39 }
 0x4dd   : > { %2147 = vmatprep.subr.bf16.mxu1 %v3020_v40 }
 0x4e0   : > { %2148 = vmatpush2.bf16.msra.mxu1 %v3018_v41 }
 0x4e1   : > { %2149 = vmatprep.subr.bf16.mxu1 %v3026_v43 }
 0x4e4   : > { %2150 = vmatpush2.bf16.msra.mxu1 %v3024_v45 }
 0x4e5   : > { %2151 = vmatprep.subr.bf16.mxu1 %v3032_v47 }
 0x4e8   : > { %2152 = vmatpush2.bf16.msra.mxu1 %v3030_v49 }
 0x56b   : > { %v1663_v53 = vpop.f32.mrf.mxu1 }
 0x56c   : > { %v1664_v54 = vadd.f32 %v1663_v53, %v1542_v51 }
 0x56d   : > { %v1665_v55 = vpop.f32.mrf.mxu1 }
 0x56e   : > { %v1666_v56 = vadd.f32 %v1665_v55, %v1546_v52  ;;  %v1670_v57 = vmax.f32 %v1664_v54, 0.0 }
 0x56f   : > { %v1667_v58 = vpop.f32.mrf.mxu1 }
 0x570   : > { %v1671_v59 = vmax.f32 %v1666_v56, 0.0  ;;  %v1672_v62 = vpack.c.bf16 %v1670_v57, %v1670_v57 }
 0x571   : > { %v1668_v60 = vpop.f32.mrf.mxu1 }
 0x572   : > { %v1673_v61 = vpack.c.bf16 %v1671_v59, %v1671_v59 }
 0x574   : > { %2112 = vmatprep.mubr.bf16.mxu0 %v1673_v61  ;;  %2153 = vmatprep.mubr.bf16.mxu1 %v1673_v61 }
 0x575   : > { %2113 = vmatmul.mubr.bf16.vlgmr.msra.gmra.mxu0 %v1672_v62  ;;  %2154 = vmatmul.mubr.bf16.vlgmr.msra.gmra.mxu1 %v1672_v62 }
 0x635   : > { %v2114_v6 = vpop.f32.mrf.mxu0  ;;  %v2155_v7 = vpop.f32.mrf.mxu1 }
 0x636   : > { %v2115_v8 = vadd.f32 %v2114_v6, %v1743_v2  ;;  %v2156_v9 = vadd.f32 %v2155_v7, %v1751_v3 }
 0x637   : > { %v2116_v10 = vpop.f32.mrf.mxu0  ;;  %v2157_v11 = vpop.f32.mrf.mxu1 }
 0x638   : > { %v2588_v12 = vmul.f32 -1.442695, %v2115_v8  ;;  %v2590_v13 = vmul.f32 -1.442695, %v2156_v9  ;;  %v2117_v14 = vadd.f32 %v2116_v10, %v1747_v4  ;;  %v2158_v15 = vadd.f32 %v2157_v11, %v1755_v5 }
 0x639   : > { %v2118_v16 = vpop.f32.mrf.mxu0  ;;  %v2159_v17 = vpop.f32.mrf.mxu1 }
 0x63a   : > { %3035 = vpow2.f32 %v2588_v12  ;;  %v2589_v31 = vmul.f32 -1.442695, %v2117_v14  ;;  %v2591_v18 = vmul.f32 -1.442695, %v2158_v15 }
 0x63b   : > { %3037 = vpow2.f32 %v2590_v13  ;;  %v2119_v32 = vpop.f32.mrf.mxu0  ;;  %v2160_v34 = vpop.f32.mrf.mxu1 }
 0x63c   : > { %3039 = vpow2.f32 %v2589_v31 }
 0x63d   : > { %3041 = vpow2.f32 %v2591_v18 }
 0x647   : > { %v3036_v19 = vpop.eup %3035 }
 0x648   : > { %v3038_v20 = vpop.eup %3037  ;;  %v2174_v21 = vadd.f32 1.0, %v3036_v19 }
 0x649   : > { %v3040_v22 = vpop.eup %3039  ;;  %v2176_v23 = vadd.f32 1.0, %v3038_v20 }
 0x64a   : > { %v3042_v24 = vpop.eup %3041  ;;  %3043 = vrcp.f32 %v2174_v21  ;;  %v2175_v25 = vadd.f32 1.0, %v3040_v22 }
 0x64b   : > { %3045 = vrcp.f32 %v2176_v23  ;;  %v2177_v26 = vadd.f32 1.0, %v3042_v24 }
 0x64c   : > { %3047 = vrcp.f32 %v2175_v25 }
 0x64d   : > { %3049 = vrcp.f32 %v2177_v26 }
 0x657   : > { %v3044_v27 = vpop.eup %3043 }
 0x658   : > { %v3046_v28 = vpop.eup %3045  ;;  %2186 = vst [vmem:[%s635_s13] sm:$0xff] %v3044_v27 }
 0x659   : > { %v3048_v29 = vpop.eup %3047  ;;  %2188 = vst [vmem:[%s635_s13 + $0x10] sm:$0xff] %v3046_v28 }
 0x65a   : > { %v3050_v30 = vpop.eup %3049  ;;  %2187 = vst [vmem:[%s635_s13 + $0x8] sm:$0xff] %v3048_v29 }
 0x65b   : > { %2189 = vst [vmem:[%s635_s13 + $0x18] sm:$0xff] %v3050_v30 }
 0x65c   : > { %3276 = shalt.err (!%p3273_p12)
}
 0x65d   : > { %s3277_s11 = scalar_lea.hbm %s3771_s0, 512  ;;  %s3281_s29 = scalar_lea.hbm %s3879_s12, 1024 }
 0x65e   : > { %p3278_p0 = scmp.ne.s32.totalorder %s3771_s0, %s3277_s11  ;;  %p3282_p11 = scmp.lt.s32.totalorder %s3771_s0, %s3879_s12 }
 0x65f   : > { %p3283_p13 = scmp.lt.s32.totalorder %s3281_s29, %s3277_s11 }
 0x660   : > { %p3279_p9 = pnand %p3278_p0, %p3880_p1 }
 0x661   : > { %p3284_p5 = por %p3283_p13, %p3282_p11 }
 0x662   : > { %p3280_p10 = pneg %p3279_p9 }
 0x664   : > { %p3285_p8 = pnand %p3284_p5, %p3280_p10 }
 0x666   : > { %3288 = shalt.err (!%p3285_p8)
}
 0x667   : > { %2695 = dma.vmem_to_hbm [thread:$0]  (%p3880_p1), %s3773_s16, 512, %s3771_s0, %s2192_s24  }
 0x668 PF: > { %s2225_s28 = sand.u32 1, %s3335_s18   ;;  %p3881_p4 = scmp.ne.s32.totalorder %s3862_s30, 0 }
 0x669   : > { %p3882_p6 = scmp.ge.s32.totalorder %s3347_s21, 2  ;;  %s2226_s13 = scalar_lea.sflag [#allocation4], %s2225_s28 }
 0x66b   : > { %p2724_p3 = pnand %p3882_p6, %p3881_p4 }
 0x66d   : > { %p2725_p7 = pneg %p2724_p3 }
 0x66f   : > { %3330 = dma.done.wait (%p2725_p7), %s2226_s13, 512  }
 0x670   : > { %3332 = vsyncadd (%p2725_p7), %s2226_s13, 4294966784  ;;  %s3883_s8 = sld [smem:[#allocation24_spill]]  ;;  %p35_p2 = scmp.ge.s32.totalorder %s3562_s2, 4  }
 0x671   : > { %s3884_s18 = smov %s3339_s19  ;;  %s3885_s19 = smov %s3343_s20 }
 0x672   : > { %s3887_s21 = smov %s3562_s2  ;;  %37 = sbr.rel (!%p35_p2) target bundleno = 21 (0x15), region = 170 }
 0x676   : > { %s3886_s20 = smov %s3883_s8 }
 0x677   :  { %2238 = vsyncpa [#allocation3], 1 }
 0x678   :  { %2240 = vsyncpa [#allocation3 + $0x1], 1 }
 0x679   :  { %2241 = vsyncpa [#allocation6], 1 }
 0x67a   :  { %2243 = vsyncpa [#allocation6 + $0x1], 1 }
 0x67b   :  { %2244 = vsyncpa [#allocation9], 1 }
 0x67c   :  { %2245 = vsyncpa [#allocation12], 1 }
 0x67d   :  { %2246 = vsyncpa [#allocation15], 1 }
 0x67e   :  { %2247 = vsyncpa [#allocation4], 1 }
 0x67f   :  { %2249 = vsyncpa [#allocation4 + $0x1], 1 }

</bundles_post_ra>
